<compile_context>
chip_gen: v6e
topology: v6e:2x2x1
jax: 0.10.0
libtpu: 0.0.40
codegen_flags: <defaults>
</compile_context>

<pallas_src>
import math
from functools import partial

import jax
import jax.numpy as jnp
from jax.experimental import pallas as pl
from jax.experimental.pallas import tpu as pltpu

BN_EPS = 1e-5
LANE = 128
SUB = 16                               # bf16-friendly sublane granularity for row tiles
VMEM_LIMIT = 32 * 1024 * 1024          # explicit scoped-VMEM limit (v7x default; < v5e/v6e physical)
TILE_VMEM_BUDGET = 20 * 1024 * 1024    # what the double-buffered tile set may use
TM_CAP = 8192


def _round_up(x, m):
    return (x + m - 1) // m * m


def _choose_tiling(m, k_pad, cout_pad):
    """Largest padding-friendly row tile that fits the per-call VMEM budget."""
    # double-buffered bf16 x tile + double-buffered bf16 out tile, per row
    bytes_per_row = 2 * k_pad * 2 + 2 * cout_pad * 2
    fixed = 2 * k_pad * cout_pad * 2 + 2 * 2 * cout_pad * 4 + 5 * cout_pad * 4
    tm_max = max(SUB, (TILE_VMEM_BUDGET - fixed) // bytes_per_row)
    tm_max = min(tm_max, TM_CAP) // SUB * SUB
    if m <= tm_max:                        # single tile, at most SUB-1 padded rows
        tm = _round_up(max(m, SUB), SUB)
        return tm, tm
    n_tiles = -(-m // tm_max)              # minimize padding for this tile count
    tm = _round_up(-(-m // n_tiles), SUB)
    return tm, n_tiles * tm


# ---------------------------------------------------------------------------
# Fused kernel: phase 0 = batch statistics, phase 1 = conv + BN affine.
# ---------------------------------------------------------------------------
def _fused_conv_bn_kernel(x_ref, w_ref, gb_ref, o_ref,
                          mu0_ref, sum_ref, sq_ref, scale_ref, shift_ref,
                          *, m_real, pad_rows):
    phase = pl.program_id(0)
    i = pl.program_id(1)

    # (TM, K) bf16 x (K, Cout) bf16 -> f32 on the MXU; needed in both phases.
    y = jnp.dot(x_ref[...], w_ref[...], preferred_element_type=jnp.float32)

    @pl.when(phase == 0)
    def _stats():
        @pl.when(i == 0)
        def _init():
            # Shift reference = first-tile column mean; avoids catastrophic
            # cancellation of E[y^2] - E[y]^2 when |mean| >> std.
            mu0_ref[...] = jnp.mean(y, axis=0, keepdims=True)
            sum_ref[...] = jnp.zeros_like(sum_ref)
            sq_ref[...] = jnp.zeros_like(sq_ref)

        ys = y - mu0_ref[...]
        sum_ref[...] += jnp.sum(ys, axis=0, keepdims=True)
        sq_ref[...] += jnp.sum(ys * ys, axis=0, keepdims=True)

    @pl.when(phase == 1)
    def _apply():
        @pl.when(i == 0)
        def _finalize():
            mu0 = mu0_ref[...]
            # Zero-padded rows have y == 0 exactly, so they contributed
            # (0 - mu0) to sum and mu0^2 to sumsq; remove them analytically.
            s = sum_ref[...] + pad_rows * mu0
            q = sq_ref[...] - pad_rows * (mu0 * mu0)
            inv_m = 1.0 / m_real
            dmean = s * inv_m                       # mean - mu0
            var = jnp.maximum(q * inv_m - dmean * dmean, 0.0)
            gamma = gb_ref[0:1, :]
            beta = gb_ref[1:2, :]
            sc = gamma * jax.lax.rsqrt(var + BN_EPS)
            scale_ref[...] = sc
            shift_ref[...] = beta - (mu0 + dmean) * sc

        o_ref[...] = (y * scale_ref[...] + shift_ref[...]).astype(o_ref.dtype)


def _conv_bn_pallas(x_feat, w_mat, gb, *, m_real, tm):
    """x_feat: (m_pad, k_pad) bf16, w_mat: (k_pad, cout_pad) bf16,
    gb: (2, cout_pad) f32 (gamma row 0, beta row 1).
    Returns normalized (m_pad, cout_pad) bf16."""
    m_pad, k_pad = x_feat.shape
    cout_pad = w_mat.shape[1]
    n_tiles = m_pad // tm

    kernel = partial(_fused_conv_bn_kernel,
                     m_real=float(m_real), pad_rows=float(m_pad - m_real))

    # TODO(synk): constant-index blocks (W, gb) could use pipeline_mode=
    # pl.Buffered(1) to free VMEM for very large C*eta/Cout configs.
    return pl.pallas_call(
        kernel,
        out_shape=jax.ShapeDtypeStruct((m_pad, cout_pad), jnp.bfloat16),
        grid=(2, n_tiles),
        in_specs=[
            pl.BlockSpec((tm, k_pad), lambda p, i: (i, 0)),
            pl.BlockSpec((k_pad, cout_pad), lambda p, i: (0, 0)),
            pl.BlockSpec((2, cout_pad), lambda p, i: (0, 0)),
        ],
        # Phase 0 never writes the output: park every phase-0 step on block 0
        # so no stale block is ever copied back to HBM.
        out_specs=pl.BlockSpec((tm, cout_pad), lambda p, i: (p * i, 0)),
        scratch_shapes=[pltpu.VMEM((1, cout_pad), jnp.float32)] * 5,
        compiler_params=pltpu.CompilerParams(
            dimension_semantics=("arbitrary", "arbitrary"),
            vmem_limit_bytes=VMEM_LIMIT,
        ),
    )(x_feat, w_mat, gb)


# ---------------------------------------------------------------------------
# Parameters and forward pass
# ---------------------------------------------------------------------------
def init_detgc_params(key, in_channels, out_channels, eta,
                      kernel_size=1, dilation=1):
    """Parameters of DeTGC used in forward(): learned temporal offsets `tr`,
    the Conv3d(in, out, (eta,1,1)) weight/bias and the BatchNorm3d affine."""
    ref = (kernel_size + (kernel_size - 1) * (dilation - 1) - 1) // 2
    tr = jnp.linspace(-float(ref), float(ref), eta, dtype=jnp.float32)

    fan_in = in_channels * eta
    bound = 1.0 / math.sqrt(fan_in)
    k_w, k_b = jax.random.split(key)
    weight = jax.random.uniform(k_w, (out_channels, in_channels, eta),
                                jnp.float32, -bound, bound)
    bias = jax.random.uniform(k_b, (out_channels,), jnp.float32, -bound, bound)
    gamma = jnp.ones((out_channels,), jnp.float32)
    beta = jnp.zeros((out_channels,), jnp.float32)
    return dict(tr=tr, weight=weight, bias=bias, gamma=gamma, beta=beta)


def _build_matmul_operands(x, params, stride, num_frame):
    """Deformable temporal sampling straight into the matmul layout.

    Returns x_feat (M, K) bf16 with rows (n, v, to) and features (e, c),
    w_mat (K, Cout) bf16 and the geometry (M, K, Tout)."""
    N, C, T, V = x.shape
    eta = params["tr"].shape[0]
    Tout = T // stride
    max_idx = min(num_frame, T) - 1        # PyTorch clamps to num_frame-1; never OOB here

    t0 = jnp.arange(0, T, stride, dtype=x.dtype)                  # (Tout,)
    t = t0[:, None] + params["tr"][None, :].astype(x.dtype)       # (Tout, eta)
    tdn = jnp.floor(t)
    idx1 = jnp.clip(tdn, 0, max_idx).astype(jnp.int32)
    idx2 = jnp.clip(tdn + 1.0, 0, max_idx).astype(jnp.int32)
    alpha = (tdn + 1.0 - t)[None, None, :, :, None]               # (1,1,Tout,eta,1)

    # One small relayout of the RAW input (no eta blow-up); after the gather
    # the row/feature layout is already matmul-ready (free reshape below).
    x_p = jnp.transpose(x, (0, 3, 2, 1))                          # (N, V, T, C)
    x1 = x_p[:, :, idx1, :]                                       # (N, V, Tout, eta, C)
    x2 = x_p[:, :, idx2, :]
    xs = (x1 * alpha + x2 * (1.0 - alpha)).astype(jnp.bfloat16)   # interp f32, store bf16

    M, K = N * V * Tout, eta * C
    x_feat = xs.reshape(M, K)
    # Conv3d weight (Cout, C, eta) -> (eta*C, Cout), row k = e*C + c.
    # NOTE: the Conv3d bias is intentionally dropped — training-mode BN
    # subtracts the batch mean immediately after the conv, so it cancels.
    w_mat = jnp.transpose(params["weight"], (2, 1, 0)).reshape(K, -1)
    return x_feat, w_mat.astype(jnp.bfloat16), M, K, Tout


def detgc_forward(x, params, *, stride=1, num_frame=None):
    """DeTGC.forward: deformable temporal sampling -> Conv3d((eta,1,1)) ->
    training-mode BatchNorm3d -> squeeze.  Returns (N, Cout, Tout, V)."""
    N, C, T, V = x.shape
    if num_frame is None:
        num_frame = T
    Cout = params["weight"].shape[0]

    # TODO(synk): the gather/interp below is still a wrapper-side XLA fusion;
    # folding it into the kernel would remove the eta-x HBM intermediate.
    x_feat, w_mat, M, K, Tout = _build_matmul_operands(x, params, stride, num_frame)

    cout_pad = _round_up(Cout, LANE)
    k_pad = _round_up(K, LANE)
    tm, m_pad = _choose_tiling(M, k_pad, cout_pad)

    if (m_pad, k_pad) != (M, K):
        x_feat = jnp.pad(x_feat, ((0, m_pad - M), (0, k_pad - K)))
    if (k_pad, cout_pad) != (K, Cout):
        w_mat = jnp.pad(w_mat, ((0, k_pad - K), (0, cout_pad - Cout)))
    gb = jnp.stack([jnp.pad(params["gamma"], (0, cout_pad - Cout)),
                    jnp.pad(params["beta"], (0, cout_pad - Cout))])

    v = _conv_bn_pallas(x_feat, w_mat, gb, m_real=M, tm=tm)   # (m_pad, cout_pad) bf16
    if (m_pad, cout_pad) != (M, Cout):
        v = v[:M, :Cout]
    v = v.reshape(N, V, Tout, Cout)
    # (N, V, Tout, Cout) -> (N, Cout, Tout, V); the upcast back to the input
    # dtype fuses into this single transpose pass.
    return jnp.transpose(v, (0, 3, 2, 1)).astype(x.dtype)


# ---------------------------------------------------------------------------
# Pure-JAX references for correctness checking
# ---------------------------------------------------------------------------
def _reference_forward_f32(x, params, *, stride=1, num_frame=None):
    """Faithful float32 replica of the PyTorch module (including the conv
    bias, which the kernel drops because training-mode BN cancels it)."""
    N, C, T, V = x.shape
    if num_frame is None:
        num_frame = T
    tr = params["tr"]
    t0 = jnp.arange(0, T, stride, dtype=x.dtype)
    t = t0[None, :] + tr[:, None]                                 # (eta, Tout)
    tdn = jnp.floor(t)
    idx1 = jnp.clip(tdn, 0, num_frame - 1).astype(jnp.int32)
    idx2 = jnp.clip(tdn + 1.0, 0, num_frame - 1).astype(jnp.int32)
    alpha = (tdn + 1.0 - t)[None, None, :, :, None]
    x1 = x[:, :, idx1, :]                                         # (N, C, eta, Tout, V)
    x2 = x[:, :, idx2, :]
    xs = x1 * alpha + x2 * (1.0 - alpha)
    y = jnp.einsum('oce,ncetv->notv', params["weight"], xs) \
        + params["bias"][None, :, None, None]
    mean = jnp.mean(y, axis=(0, 2, 3), keepdims=True)
    var = jnp.mean((y - mean) ** 2, axis=(0, 2, 3), keepdims=True)
    y = (y - mean) * jax.lax.rsqrt(var + BN_EPS)
    return params["gamma"][None, :, None, None] * y \
        + params["beta"][None, :, None, None]


def _reference_forward_bf16(x, params, *, stride=1, num_frame=None):
    """Plain-JAX replica of the Pallas pipeline (identical bf16 matmul
    operands, f32 statistics, bf16 output) — tight correctness check."""
    N, C, T, V = x.shape
    if num_frame is None:
        num_frame = T
    Cout = params["weight"].shape[0]
    x_feat, w_mat, M, K, Tout = _build_matmul_operands(x, params, stride, num_frame)
    y = jnp.dot(x_feat, w_mat, preferred_element_type=jnp.float32)
    mean = jnp.mean(y, axis=0)
    var = jnp.mean((y - mean[None, :]) ** 2, axis=0)
    scale = params["gamma"] * jax.lax.rsqrt(var + BN_EPS)
    shift = params["beta"] - mean * scale
    v = (y * scale[None, :] + shift[None, :]).astype(jnp.bfloat16)
    v = v.reshape(N, V, Tout, Cout)
    return jnp.transpose(v, (0, 3, 2, 1)).astype(x.dtype)


if __name__ == "__main__":
    # Small shapes consistent with DeGCN: batch N=2, C=32 input channels,
    # T=16 frames, V=25 joints, out_channels=64, eta=4 temporal samples,
    # kernel_size=5 -> fractional learned offsets tr = linspace(-2, 2, 4).
    N, C, T, V = 2, 32, 16, 25
    out_channels, eta, kernel_size, stride = 64, 4, 5, 1

    key = jax.random.PRNGKey(0)
    k_x, k_p = jax.random.split(key)
    x = jax.random.normal(k_x, (N, C, T, V), jnp.float32)
    params = init_detgc_params(k_p, C, out_channels, eta, kernel_size=kernel_size)

    fwd = jax.jit(partial(detgc_forward, stride=stride, num_frame=T))
    out = jax.block_until_ready(fwd(x, params))
    assert out.shape == (N, out_channels, T // stride, V)
    assert bool(jnp.all(jnp.isfinite(out)))

    # Tight check vs. a plain-JAX replica of the kernel pipeline (identical
    # bf16 matmul operands / bf16 output; tolerance covers bf16 output ulps).
    ref_bf16 = _reference_forward_bf16(x, params, stride=stride, num_frame=T)
    assert bool(jnp.allclose(out, ref_bf16, atol=2e-2, rtol=2e-2))

    # Looser check vs. the fully-f32 faithful replica of the PyTorch module —
    # differences are only bf16 rounding of the matmul operands and output.
    ref_f32 = _reference_forward_f32(x, params, stride=stride, num_frame=T)
    assert bool(jnp.allclose(out, ref_f32, atol=8e-2, rtol=8e-2))

    print("KERNEL_OK")
</pallas_src>

<mosaic_0001>
module attributes {stable_mosaic.version = 11 : i64} {
  func.func @_fused_conv_bn_kernel(%arg0: i32, %arg1: i32, %arg2: memref<800x128xbf16, #tpu.memory_space<vmem>>, %arg3: memref<128x128xbf16, #tpu.memory_space<vmem>>, %arg4: memref<2x128xf32, #tpu.memory_space<vmem>>, %arg5: memref<800x128xbf16, #tpu.memory_space<vmem>>, %arg6: memref<1x128xf32, #tpu.memory_space<vmem>>, %arg7: memref<1x128xf32, #tpu.memory_space<vmem>>, %arg8: memref<1x128xf32, #tpu.memory_space<vmem>>, %arg9: memref<1x128xf32, #tpu.memory_space<vmem>>, %arg10: memref<1x128xf32, #tpu.memory_space<vmem>>) attributes {dimension_semantics = [#tpu.dimension_semantics<arbitrary>, #tpu.dimension_semantics<arbitrary>], iteration_bounds = array<i64: 2, 1>, scalar_prefetch = 0 : i64, scratch_operands = 5 : i64, tpu.core_type = #tpu.core_type<tc>, window_params = [{transform_indices = @transform_0, window_bounds = array<i64: 800, 128>}, {pipeline_mode = #tpu.pipeline_mode<synchronous>, transform_indices = @transform_1, window_bounds = array<i64: 128, 128>}, {pipeline_mode = #tpu.pipeline_mode<synchronous>, transform_indices = @transform_2, window_bounds = array<i64: 2, 128>}, {transform_indices = @transform_3, window_bounds = array<i64: 800, 128>}]} {
    %c0 = arith.constant 0 : index
    %c0_0 = arith.constant 0 : index
    %0 = vector.load %arg2[%c0, %c0_0] : memref<800x128xbf16, #tpu.memory_space<vmem>>, vector<800x128xbf16>
    %c0_1 = arith.constant 0 : index
    %c0_2 = arith.constant 0 : index
    %1 = vector.load %arg3[%c0_1, %c0_2] : memref<128x128xbf16, #tpu.memory_space<vmem>>, vector<128x128xbf16>
    %cst = arith.constant dense<0.000000e+00> : vector<800x128xf32>
    %2 = tpu.matmul %0, %1, %cst {dimension_numbers = #tpu.dot_dimension_numbers<[1], [0], [0], [1], [0, 0, 1, 1], [], []>} : vector<800x128xbf16>, vector<128x128xbf16>, vector<800x128xf32> -> vector<800x128xf32>
    %c0_i32 = arith.constant 0 : i32
    %3 = arith.cmpi eq, %arg0, %c0_i32 : i32
    %4 = arith.extui %3 : i1 to i32
    %c0_i32_3 = arith.constant 0 : i32
    %5 = arith.cmpi ne, %4, %c0_i32_3 : i32
    scf.if %5 {
      %c0_i32_5 = arith.constant 0 : i32
      %9 = arith.cmpi eq, %arg1, %c0_i32_5 : i32
      %10 = arith.extui %9 : i1 to i32
      %c0_i32_6 = arith.constant 0 : i32
      %11 = arith.cmpi ne, %10, %c0_i32_6 : i32
      scf.if %11 {
        %cst_19 = arith.constant dense<0.000000e+00> : vector<128xf32>
        %26 = vector.multi_reduction <add>, %2, %cst_19 [0] : vector<800x128xf32> to vector<128xf32>
        %27 = vector.shape_cast %26 : vector<128xf32> to vector<1x128xf32>
        %cst_20 = arith.constant 8.000000e+02 : f32
        %28 = vector.broadcast %cst_20 : f32 to vector<1x128xf32>
        %29 = arith.divf %27, %28 : vector<1x128xf32>
        %c0_21 = arith.constant 0 : index
        %c0_22 = arith.constant 0 : index
        %30 = vector.load %arg6[%c0_21, %c0_22] : memref<1x128xf32, #tpu.memory_space<vmem>>, vector<1x128xf32>
        tpu.vector_store %arg6[%c0_21, %c0_22], %29 {strides = array<i32>} : memref<1x128xf32, #tpu.memory_space<vmem>>, vector<1x128xf32>,
        %cst_23 = arith.constant 0.000000e+00 : f32
        %31 = vector.broadcast %cst_23 : f32 to vector<1x128xf32>
        %c0_24 = arith.constant 0 : index
        %c0_25 = arith.constant 0 : index
        %32 = vector.load %arg7[%c0_24, %c0_25] : memref<1x128xf32, #tpu.memory_space<vmem>>, vector<1x128xf32>
        tpu.vector_store %arg7[%c0_24, %c0_25], %31 {strides = array<i32>} : memref<1x128xf32, #tpu.memory_space<vmem>>, vector<1x128xf32>,
        %cst_26 = arith.constant 0.000000e+00 : f32
        %33 = vector.broadcast %cst_26 : f32 to vector<1x128xf32>
        %c0_27 = arith.constant 0 : index
        %c0_28 = arith.constant 0 : index
        %34 = vector.load %arg8[%c0_27, %c0_28] : memref<1x128xf32, #tpu.memory_space<vmem>>, vector<1x128xf32>
        tpu.vector_store %arg8[%c0_27, %c0_28], %33 {strides = array<i32>} : memref<1x128xf32, #tpu.memory_space<vmem>>, vector<1x128xf32>,
      } else {
      }
      %c0_7 = arith.constant 0 : index
      %c0_8 = arith.constant 0 : index
      %12 = vector.load %arg6[%c0_7, %c0_8] : memref<1x128xf32, #tpu.memory_space<vmem>>, vector<1x128xf32>
      %13 = vector.broadcast %12 : vector<1x128xf32> to vector<800x128xf32>
      %14 = arith.subf %2, %13 : vector<800x128xf32>
      %c0_9 = arith.constant 0 : index
      %c0_10 = arith.constant 0 : index
      %15 = vector.load %arg7[%c0_9, %c0_10] : memref<1x128xf32, #tpu.memory_space<vmem>>, vector<1x128xf32>
      %cst_11 = arith.constant dense<0.000000e+00> : vector<128xf32>
      %16 = vector.multi_reduction <add>, %14, %cst_11 [0] : vector<800x128xf32> to vector<128xf32>
      %17 = vector.shape_cast %16 : vector<128xf32> to vector<1x128xf32>
      %18 = arith.addf %15, %17 : vector<1x128xf32>
      %c0_12 = arith.constant 0 : index
      %c0_13 = arith.constant 0 : index
      %19 = vector.load %arg7[%c0_12, %c0_13] : memref<1x128xf32, #tpu.memory_space<vmem>>, vector<1x128xf32>
      tpu.vector_store %arg7[%c0_12, %c0_13], %18 {strides = array<i32>} : memref<1x128xf32, #tpu.memory_space<vmem>>, vector<1x128xf32>,
      %c0_14 = arith.constant 0 : index
      %c0_15 = arith.constant 0 : index
      %20 = vector.load %arg8[%c0_14, %c0_15] : memref<1x128xf32, #tpu.memory_space<vmem>>, vector<1x128xf32>
      %21 = arith.mulf %14, %14 : vector<800x128xf32>
      %cst_16 = arith.constant dense<0.000000e+00> : vector<128xf32>
      %22 = vector.multi_reduction <add>, %21, %cst_16 [0] : vector<800x128xf32> to vector<128xf32>
      %23 = vector.shape_cast %22 : vector<128xf32> to vector<1x128xf32>
      %24 = arith.addf %20, %23 : vector<1x128xf32>
      %c0_17 = arith.constant 0 : index
      %c0_18 = arith.constant 0 : index
      %25 = vector.load %arg8[%c0_17, %c0_18] : memref<1x128xf32, #tpu.memory_space<vmem>>, vector<1x128xf32>
      tpu.vector_store %arg8[%c0_17, %c0_18], %24 {strides = array<i32>} : memref<1x128xf32, #tpu.memory_space<vmem>>, vector<1x128xf32>,
    } else {
    }
    %c1_i32 = arith.constant 1 : i32
    %6 = arith.cmpi eq, %arg0, %c1_i32 : i32
    %7 = arith.extui %6 : i1 to i32
    %c0_i32_4 = arith.constant 0 : i32
    %8 = arith.cmpi ne, %7, %c0_i32_4 : i32
    scf.if %8 {
      %c0_i32_5 = arith.constant 0 : i32
      %9 = arith.cmpi eq, %arg1, %c0_i32_5 : i32
      %10 = arith.extui %9 : i1 to i32
      %c0_i32_6 = arith.constant 0 : i32
      %11 = arith.cmpi ne, %10, %c0_i32_6 : i32
      scf.if %11 {
        %c0_13 = arith.constant 0 : index
        %c0_14 = arith.constant 0 : index
        %20 = vector.load %arg6[%c0_13, %c0_14] : memref<1x128xf32, #tpu.memory_space<vmem>>, vector<1x128xf32>
        %c0_15 = arith.constant 0 : index
        %c0_16 = arith.constant 0 : index
        %21 = vector.load %arg7[%c0_15, %c0_16] : memref<1x128xf32, #tpu.memory_space<vmem>>, vector<1x128xf32>
        %cst_17 = arith.constant 0.000000e+00 : f32
        %22 = vector.broadcast %cst_17 : f32 to vector<1x128xf32>
        %23 = arith.mulf %22, %20 : vector<1x128xf32>
        %24 = arith.addf %21, %23 : vector<1x128xf32>
        %c0_18 = arith.constant 0 : index
        %c0_19 = arith.constant 0 : index
        %25 = vector.load %arg8[%c0_18, %c0_19] : memref<1x128xf32, #tpu.memory_space<vmem>>, vector<1x128xf32>
        %26 = arith.mulf %20, %20 : vector<1x128xf32>
        %cst_20 = arith.constant 0.000000e+00 : f32
        %27 = vector.broadcast %cst_20 : f32 to vector<1x128xf32>
        %28 = arith.mulf %27, %26 : vector<1x128xf32>
        %29 = arith.subf %25, %28 : vector<1x128xf32>
        %cst_21 = arith.constant 1.250000e-03 : f32
        %30 = vector.broadcast %cst_21 : f32 to vector<1x128xf32>
        %31 = arith.mulf %24, %30 : vector<1x128xf32>
        %cst_22 = arith.constant 1.250000e-03 : f32
        %32 = vector.broadcast %cst_22 : f32 to vector<1x128xf32>
        %33 = arith.mulf %29, %32 : vector<1x128xf32>
        %34 = arith.mulf %31, %31 : vector<1x128xf32>
        %35 = arith.subf %33, %34 : vector<1x128xf32>
        %cst_23 = arith.constant 0.000000e+00 : f32
        %36 = vector.broadcast %cst_23 : f32 to vector<1x128xf32>
        %37 = arith.maximumf %35, %36 : vector<1x128xf32>
        %c0_24 = arith.constant 0 : index
        %c0_25 = arith.constant 0 : index
        %38 = vector.load %arg4[%c0_24, %c0_25] : memref<2x128xf32, #tpu.memory_space<vmem>>, vector<1x128xf32>
        %c1 = arith.constant 1 : index
        %c0_26 = arith.constant 0 : index
        %39 = vector.load %arg4[%c1, %c0_26] : memref<2x128xf32, #tpu.memory_space<vmem>>, vector<1x128xf32>
        %cst_27 = arith.constant 9.99999974E-6 : f32
        %40 = vector.broadcast %cst_27 : f32 to vector<1x128xf32>
        %41 = arith.addf %37, %40 : vector<1x128xf32>
        %42 = math.rsqrt %41 : vector<1x128xf32>
        %43 = arith.mulf %38, %42 : vector<1x128xf32>
        %c0_28 = arith.constant 0 : index
        %c0_29 = arith.constant 0 : index
        %44 = vector.load %arg9[%c0_28, %c0_29] : memref<1x128xf32, #tpu.memory_space<vmem>>, vector<1x128xf32>
        tpu.vector_store %arg9[%c0_28, %c0_29], %43 {strides = array<i32>} : memref<1x128xf32, #tpu.memory_space<vmem>>, vector<1x128xf32>,
        %45 = arith.addf %20, %31 : vector<1x128xf32>
        %46 = arith.mulf %45, %43 : vector<1x128xf32>
        %47 = arith.subf %39, %46 : vector<1x128xf32>
        %c0_30 = arith.constant 0 : index
        %c0_31 = arith.constant 0 : index
        %48 = vector.load %arg10[%c0_30, %c0_31] : memref<1x128xf32, #tpu.memory_space<vmem>>, vector<1x128xf32>
        tpu.vector_store %arg10[%c0_30, %c0_31], %47 {strides = array<i32>} : memref<1x128xf32, #tpu.memory_space<vmem>>, vector<1x128xf32>,
      } else {
      }
      %c0_7 = arith.constant 0 : index
      %c0_8 = arith.constant 0 : index
      %12 = vector.load %arg9[%c0_7, %c0_8] : memref<1x128xf32, #tpu.memory_space<vmem>>, vector<1x128xf32>
      %13 = vector.broadcast %12 : vector<1x128xf32> to vector<800x128xf32>
      %14 = arith.mulf %2, %13 : vector<800x128xf32>
      %c0_9 = arith.constant 0 : index
      %c0_10 = arith.constant 0 : index
      %15 = vector.load %arg10[%c0_9, %c0_10] : memref<1x128xf32, #tpu.memory_space<vmem>>, vector<1x128xf32>
      %16 = vector.broadcast %15 : vector<1x128xf32> to vector<800x128xf32>
      %17 = arith.addf %14, %16 : vector<800x128xf32>
      %18 = arith.truncf %17 : vector<800x128xf32> to vector<800x128xbf16>
      %c0_11 = arith.constant 0 : index
      %c0_12 = arith.constant 0 : index
      %19 = vector.load %arg5[%c0_11, %c0_12] : memref<800x128xbf16, #tpu.memory_space<vmem>>, vector<800x128xbf16>
      tpu.vector_store %arg5[%c0_11, %c0_12], %18 {strides = array<i32>} : memref<800x128xbf16, #tpu.memory_space<vmem>>, vector<800x128xbf16>,
    } else {
    }
    return
  }
  func.func @transform_0(%arg0: i32, %arg1: i32) -> (i32, i32) {
    %c0_i32 = arith.constant 0 : i32
    %c0_i32_0 = arith.constant 0 : i32
    return %arg1, %c0_i32 : i32, i32
  }
  func.func @transform_1(%arg0: i32, %arg1: i32) -> (i32, i32) {
    %c0_i32 = arith.constant 0 : i32
    %c0_i32_0 = arith.constant 0 : i32
    %c0_i32_1 = arith.constant 0 : i32
    return %c0_i32, %c0_i32_0 : i32, i32
  }
  func.func @transform_2(%arg0: i32, %arg1: i32) -> (i32, i32) {
    %c0_i32 = arith.constant 0 : i32
    %c0_i32_0 = arith.constant 0 : i32
    %c0_i32_1 = arith.constant 0 : i32
    return %c0_i32, %c0_i32_0 : i32, i32
  }
  func.func @transform_3(%arg0: i32, %arg1: i32) -> (i32, i32) {
    %0 = arith.muli %arg0, %arg1 : i32
    %c0_i32 = arith.constant 0 : i32
    %c0_i32_0 = arith.constant 0 : i32
    return %0, %c0_i32 : i32, i32
  }
}

</mosaic_0001>

<bundles_post_ra>
// kernel: detgc_forward.1
= control target key start
LH: loop header
LB: loop body
LE: loop exit
PB: predicated region body
PF: predicated region fallthrough
CT: control target
= control target key end

     0   :  { %s3337_s12 = smov 0   ;;  %s3339_s13 = smov 0   ;;  %s4504_s0 = inlined_call_operand.vmem [shape: bf16[800,128], index: 0, kind: input, shape index: {}]   ;;  %s4505_s1 = inlined_call_operand.vmem [shape: bf16[128,128], index: 1, kind: input, shape index: {}]   ;;  %s4506_s2 = inlined_call_operand.vmem [shape: f32[2,128], index: 2, kind: input, shape index: {}]   ;;  %s4507_s3 = inlined_call_operand.vmem [shape: bf16[800,128], index: 3, kind: output, shape index: {}]  }
   0x1   :  { %s3341_s14 = smov 0  }
   0x2 LB: > { %s25_s15 = sadd.s32 1, %s3310_s13  ;;  %p2450_p0 = scmp.ge.s32.totalorder %s3314_s14, 1  ;;  %s3314_s14 = sphi %s3341_s14, %s13_s14   ;;  %s3310_s13 = sphi %s3339_s13, %s4839_s13   ;;  %s3306_s12 = sphi %s3337_s12, %s4838_s12  }
   0x3   : > { %p27_p1 = scmp.ge.s32.totalorder %s25_s15, 2  ;;  %p152_p2 = scmp.lt.s32.totalorder %s3314_s14, 3 }
   0x5   : > { %s4841_s15 = smov (%p27_p1, %s25_s15), 0  ;;  %p153_p3 = pnand %p2450_p0, %p152_p2 }
   0x7   : > { %156 = sbr.rel (%p153_p3) target bundleno = 912 (0x390), region = 32 }
   0xc   : > { %v3232_v0 = vld [vmem:[%s4505_s1 + $0x38] sm:$0xff]   ;;  %v3233_v1 = vld [vmem:[%s4505_s1 + $0x30] sm:$0xff]   ;;  %v3234_v2 = vld [vmem:[%s4505_s1 + $0x28] sm:$0xff]   ;;  %p2509_p4 = scmp.ne.s32.totalorder %s3306_s12, 0 }
   0xd   : > { %3075 = vmatprep.subr.bf16.mxu0 %v3232_v0  ;;  %3191 = vmatprep.subr.bf16.mxu1 %v3232_v0  ;;  %v3235_v3 = vld [vmem:[%s4505_s1 + $0x20] sm:$0xff]   ;;  %v3242_v5 = vld [vmem:[%s4504_s0 + $0xd0] sm:$0xff]   ;;  %v3236_v6 = vld [vmem:[%s4505_s1 + $0x18] sm:$0xff]  }
   0xe   : > { %3076 = vmatpush3.bf16.msra.mxu0 %v3232_v0  ;;  %3199 = vmatpush3.bf16.msra.mxu1 %v3232_v0  ;;  %v3240_v4 = vld [vmem:[%s4504_s0] sm:$0xff]   ;;  %v3237_v7 = vld [vmem:[%s4505_s1 + $0x10] sm:$0xff]   ;;  %v3238_v8 = vld [vmem:[%s4505_s1 + $0x8] sm:$0xff]  }
   0xf   : > { %3077 = vmatprep.subr.bf16.mxu0 %v3233_v1  ;;  %3192 = vmatprep.subr.bf16.mxu1 %v3233_v1  ;;  %v3239_v9 = vld [vmem:[%s4505_s1] sm:$0xff]   ;;  %v3241_v10 = vld [vmem:[%s4504_s0 + $0x8] sm:$0xff]   ;;  %v3243_v11 = vld [vmem:[%s4504_s0 + $0xd8] sm:$0xff]  }
  0x10   : > { %3091 = vmatprep.mubr.bf16.mxu0 %v3240_v4  ;;  %3143 = vmatprep.mubr.bf16.mxu1 %v3242_v5  ;;  %v3244_v12 = vld [vmem:[%s4504_s0 + $0x10] sm:$0xff]   ;;  %v3246_v13 = vld [vmem:[%s4504_s0 + $0xe0] sm:$0xff]   ;;  %v3245_v14 = vld [vmem:[%s4504_s0 + $0x18] sm:$0xff]  }
  0x11   : > { %v3247_v15 = vld [vmem:[%s4504_s0 + $0xe8] sm:$0xff]   ;;  %v3248_v16 = vld [vmem:[%s4504_s0 + $0x20] sm:$0xff]   ;;  %v3250_v17 = vld [vmem:[%s4504_s0 + $0xf0] sm:$0xff]  }
  0x12   : > { %3078 = vmatpush3.bf16.msra.mxu0 %v3233_v1  ;;  %3200 = vmatpush3.bf16.msra.mxu1 %v3233_v1  ;;  %v3249_v18 = vld [vmem:[%s4504_s0 + $0x28] sm:$0xff]   ;;  %v3251_v19 = vld [vmem:[%s4504_s0 + $0xf8] sm:$0xff]   ;;  %v3252_v20 = vld [vmem:[%s4504_s0 + $0x30] sm:$0xff]  }
  0x13   : > { %3079 = vmatprep.subr.bf16.mxu0 %v3234_v2  ;;  %3193 = vmatprep.subr.bf16.mxu1 %v3234_v2  ;;  %v3254_v21 = vld [vmem:[%s4504_s0 + $0x100] sm:$0xff]   ;;  %v3253_v22 = vld [vmem:[%s4504_s0 + $0x38] sm:$0xff]   ;;  %v3255_v23 = vld [vmem:[%s4504_s0 + $0x108] sm:$0xff]  }
  0x14   : > { %v3256_v24 = vld [vmem:[%s4504_s0 + $0x40] sm:$0xff]   ;;  %v3258_v25 = vld [vmem:[%s4504_s0 + $0x110] sm:$0xff]   ;;  %v3257_v26 = vld [vmem:[%s4504_s0 + $0x48] sm:$0xff]  }
  0x15   : > { %v3259_v27 = vld [vmem:[%s4504_s0 + $0x118] sm:$0xff]   ;;  %v3260_v28 = vld [vmem:[%s4504_s0 + $0x50] sm:$0xff]   ;;  %v3262_v29 = vld [vmem:[%s4504_s0 + $0x120] sm:$0xff]  }
  0x16   : > { %3080 = vmatpush3.bf16.msra.mxu0 %v3234_v2  ;;  %3201 = vmatpush3.bf16.msra.mxu1 %v3234_v2  ;;  %v3261_v30 = vld [vmem:[%s4504_s0 + $0x58] sm:$0xff]   ;;  %v3263_v31 = vld [vmem:[%s4504_s0 + $0x128] sm:$0xff]   ;;  %v3264_v32 = vld [vmem:[%s4504_s0 + $0x60] sm:$0xff]  }
  0x17   : > { %3081 = vmatprep.subr.bf16.mxu0 %v3235_v3  ;;  %3194 = vmatprep.subr.bf16.mxu1 %v3235_v3  ;;  %v3266_v33 = vld [vmem:[%s4504_s0 + $0x130] sm:$0xff]   ;;  %v3265_v34 = vld [vmem:[%s4504_s0 + $0x68] sm:$0xff]   ;;  %v3267_v35 = vld [vmem:[%s4504_s0 + $0x138] sm:$0xff]  }
  0x18   : > { %v3268_v36 = vld [vmem:[%s4504_s0 + $0x70] sm:$0xff]   ;;  %v3270_v37 = vld [vmem:[%s4504_s0 + $0x140] sm:$0xff]   ;;  %v3269_v38 = vld [vmem:[%s4504_s0 + $0x78] sm:$0xff]  }
  0x19   : > { %v3271_v39 = vld [vmem:[%s4504_s0 + $0x148] sm:$0xff]   ;;  %v3272_v40 = vld [vmem:[%s4504_s0 + $0x80] sm:$0xff]   ;;  %v3274_v41 = vld [vmem:[%s4504_s0 + $0x150] sm:$0xff]  }
  0x1a   : > { %3082 = vmatpush3.bf16.msra.mxu0 %v3235_v3  ;;  %3202 = vmatpush3.bf16.msra.mxu1 %v3235_v3  ;;  %v3273_v42 = vld [vmem:[%s4504_s0 + $0x88] sm:$0xff]   ;;  %v3275_v43 = vld [vmem:[%s4504_s0 + $0x158] sm:$0xff]   ;;  %v3276_v44 = vld [vmem:[%s4504_s0 + $0x90] sm:$0xff]  }
  0x1b   : > { %3083 = vmatprep.subr.bf16.mxu0 %v3236_v6  ;;  %3195 = vmatprep.subr.bf16.mxu1 %v3236_v6  ;;  %v3278_v45 = vld [vmem:[%s4504_s0 + $0x160] sm:$0xff]   ;;  %v3277_v46 = vld [vmem:[%s4504_s0 + $0x98] sm:$0xff]   ;;  %v3279_v47 = vld [vmem:[%s4504_s0 + $0x168] sm:$0xff]  }
  0x1c   : > { %v3280_v48 = vld [vmem:[%s4504_s0 + $0xa0] sm:$0xff]   ;;  %v3282_v49 = vld [vmem:[%s4504_s0 + $0x170] sm:$0xff]   ;;  %v3281_v50 = vld [vmem:[%s4504_s0 + $0xa8] sm:$0xff]  }
  0x1d   : > { %v3283_v51 = vld [vmem:[%s4504_s0 + $0x178] sm:$0xff]   ;;  %v3284_v52 = vld [vmem:[%s4504_s0 + $0xb0] sm:$0xff]   ;;  %v3286_v53 = vld [vmem:[%s4504_s0 + $0x180] sm:$0xff]  }
  0x1e   : > { %3084 = vmatpush3.bf16.msra.mxu0 %v3236_v6  ;;  %3203 = vmatpush3.bf16.msra.mxu1 %v3236_v6  ;;  %v3285_v54 = vld [vmem:[%s4504_s0 + $0xb8] sm:$0xff]   ;;  %v3287_v55 = vld [vmem:[%s4504_s0 + $0x188] sm:$0xff]   ;;  %v3288_v56 = vld [vmem:[%s4504_s0 + $0xc0] sm:$0xff]  }
  0x1f   : > { %3085 = vmatprep.subr.bf16.mxu0 %v3237_v7  ;;  %3196 = vmatprep.subr.bf16.mxu1 %v3237_v7  ;;  %v3289_v57 = vld [vmem:[%s4504_s0 + $0xc8] sm:$0xff]  }
  0x22   : > { %3086 = vmatpush3.bf16.msra.mxu0 %v3237_v7  ;;  %3204 = vmatpush3.bf16.msra.mxu1 %v3237_v7 }
  0x23   : > { %3087 = vmatprep.subr.bf16.mxu0 %v3238_v8  ;;  %3197 = vmatprep.subr.bf16.mxu1 %v3238_v8 }
  0x26   : > { %3088 = vmatpush3.bf16.msra.mxu0 %v3238_v8  ;;  %3205 = vmatpush3.bf16.msra.mxu1 %v3238_v8 }
  0x27   : > { %3089 = vmatprep.subr.bf16.mxu0 %v3239_v9  ;;  %3198 = vmatprep.subr.bf16.mxu1 %v3239_v9 }
  0x2a   : > { %3090 = vmatpush3.bf16.msra.mxu0 %v3239_v9  ;;  %3206 = vmatpush3.bf16.msra.mxu1 %v3239_v9 }
  0x2d   : > { %3092 = vmatmul.mubr.bf16.vlgmr.msra.gmra.mxu0 %v3241_v10  ;;  %3144 = vmatmul.mubr.bf16.vlgmr.msra.gmra.mxu1 %v3243_v11 }
  0x2e   : > { %3095 = vmatprep.mubr.bf16.mxu0 %v3244_v12  ;;  %3147 = vmatprep.mubr.bf16.mxu1 %v3246_v13 }
  0x35   : > { %3096 = vmatmul.mubr.bf16.gmra.mxu0 %v3245_v14  ;;  %3148 = vmatmul.mubr.bf16.gmra.mxu1 %v3247_v15 }
  0x36   : > { %3099 = vmatprep.mubr.bf16.mxu0 %v3248_v16  ;;  %3151 = vmatprep.mubr.bf16.mxu1 %v3250_v17 }
  0x3d   : > { %3100 = vmatmul.mubr.bf16.gmra.mxu0 %v3249_v18  ;;  %3152 = vmatmul.mubr.bf16.gmra.mxu1 %v3251_v19 }
  0x3e   : > { %3103 = vmatprep.mubr.bf16.mxu0 %v3252_v20  ;;  %3155 = vmatprep.mubr.bf16.mxu1 %v3254_v21 }
  0x45   : > { %3104 = vmatmul.mubr.bf16.gmra.mxu0 %v3253_v22  ;;  %3156 = vmatmul.mubr.bf16.gmra.mxu1 %v3255_v23 }
  0x46   : > { %3107 = vmatprep.mubr.bf16.mxu0 %v3256_v24  ;;  %3159 = vmatprep.mubr.bf16.mxu1 %v3258_v25 }
  0x4d   : > { %3108 = vmatmul.mubr.bf16.gmra.mxu0 %v3257_v26  ;;  %3160 = vmatmul.mubr.bf16.gmra.mxu1 %v3259_v27 }
  0x4e   : > { %3111 = vmatprep.mubr.bf16.mxu0 %v3260_v28  ;;  %3163 = vmatprep.mubr.bf16.mxu1 %v3262_v29 }
  0x55   : > { %3112 = vmatmul.mubr.bf16.gmra.mxu0 %v3261_v30  ;;  %3164 = vmatmul.mubr.bf16.gmra.mxu1 %v3263_v31 }
  0x56   : > { %3115 = vmatprep.mubr.bf16.mxu0 %v3264_v32  ;;  %3167 = vmatprep.mubr.bf16.mxu1 %v3266_v33 }
  0x5d   : > { %3116 = vmatmul.mubr.bf16.gmra.mxu0 %v3265_v34  ;;  %3168 = vmatmul.mubr.bf16.gmra.mxu1 %v3267_v35 }
  0x5e   : > { %3119 = vmatprep.mubr.bf16.mxu0 %v3268_v36  ;;  %3171 = vmatprep.mubr.bf16.mxu1 %v3270_v37 }
  0x65   : > { %3120 = vmatmul.mubr.bf16.gmra.mxu0 %v3269_v38  ;;  %3172 = vmatmul.mubr.bf16.gmra.mxu1 %v3271_v39 }
  0x66   : > { %3123 = vmatprep.mubr.bf16.mxu0 %v3272_v40  ;;  %3175 = vmatprep.mubr.bf16.mxu1 %v3274_v41 }
  0x6d   : > { %3124 = vmatmul.mubr.bf16.gmra.mxu0 %v3273_v42  ;;  %3176 = vmatmul.mubr.bf16.gmra.mxu1 %v3275_v43 }
  0x6e   : > { %3127 = vmatprep.mubr.bf16.mxu0 %v3276_v44  ;;  %3179 = vmatprep.mubr.bf16.mxu1 %v3278_v45 }
  0x75   : > { %3128 = vmatmul.mubr.bf16.gmra.mxu0 %v3277_v46  ;;  %3180 = vmatmul.mubr.bf16.gmra.mxu1 %v3279_v47 }
  0x76   : > { %3131 = vmatprep.mubr.bf16.mxu0 %v3280_v48  ;;  %3183 = vmatprep.mubr.bf16.mxu1 %v3282_v49 }
  0x7d   : > { %3132 = vmatmul.mubr.bf16.gmra.mxu0 %v3281_v50  ;;  %3184 = vmatmul.mubr.bf16.gmra.mxu1 %v3283_v51 }
  0x7e   : > { %3135 = vmatprep.mubr.bf16.mxu0 %v3284_v52  ;;  %3187 = vmatprep.mubr.bf16.mxu1 %v3286_v53 }
  0x85   : > { %3136 = vmatmul.mubr.bf16.gmra.mxu0 %v3285_v54  ;;  %3188 = vmatmul.mubr.bf16.gmra.mxu1 %v3287_v55 }
  0x86   : > { %3139 = vmatprep.mubr.bf16.mxu0 %v3288_v56 }
  0x8d   : > { %3140 = vmatmul.mubr.bf16.gmra.mxu0 %v3289_v57 }
  0xed   : > { %v3531_v58 = vpop.f32.mrf.mxu0  ;;  %v3533_v59 = vpop.f32.mrf.mxu1 }
  0xee   : > { %4585 = vst [vmem:[#allocation7_spill] sm:$0xff] %v3531_v58  ;;  %4586 = vst [vmem:[#allocation8_spill] sm:$0xff] %v3533_v59 }
  0xef   : > { %v3535_v60 = vpop.f32.mrf.mxu0  ;;  %v3537_v61 = vpop.f32.mrf.mxu1 }
  0xf0   : > { %4587 = vst [vmem:[#allocation9_spill] sm:$0xff] %v3535_v60  ;;  %4588 = vst [vmem:[#allocation10_spill] sm:$0xff] %v3537_v61 }
  0xf1   : > { %v3539_v62 = vpop.f32.mrf.mxu0  ;;  %v3541_v63 = vpop.f32.mrf.mxu1 }
  0xf2   : > { %4589 = vst [vmem:[#allocation11_spill] sm:$0xff] %v3539_v62  ;;  %4590 = vst [vmem:[#allocation12_spill] sm:$0xff] %v3541_v63 }
  0xf3   : > { %v3543_v0 = vpop.f32.mrf.mxu0  ;;  %v3545_v1 = vpop.f32.mrf.mxu1 }
  0xf4   : > { %4591 = vst [vmem:[#allocation13_spill] sm:$0xff] %v3543_v0  ;;  %4592 = vst [vmem:[#allocation14_spill] sm:$0xff] %v3545_v1 }
  0xf5   : > { %v3547_v2 = vpop.f32.mrf.mxu0  ;;  %v3549_v3 = vpop.f32.mrf.mxu1 }
  0xf6   : > { %4593 = vst [vmem:[#allocation15_spill] sm:$0xff] %v3547_v2  ;;  %4594 = vst [vmem:[#allocation16_spill] sm:$0xff] %v3549_v3 }
  0xf7   : > { %v3551_v4 = vpop.f32.mrf.mxu0  ;;  %v3553_v5 = vpop.f32.mrf.mxu1 }
  0xf8   : > { %4595 = vst [vmem:[#allocation17_spill] sm:$0xff] %v3551_v4  ;;  %4596 = vst [vmem:[#allocation18_spill] sm:$0xff] %v3553_v5 }
  0xf9   : > { %v3555_v6 = vpop.f32.mrf.mxu0  ;;  %v3557_v7 = vpop.f32.mrf.mxu1 }
  0xfa   : > { %4597 = vst [vmem:[#allocation19_spill] sm:$0xff] %v3555_v6  ;;  %4598 = vst [vmem:[#allocation20_spill] sm:$0xff] %v3557_v7 }
  0xfb   : > { %v3559_v8 = vpop.f32.mrf.mxu0  ;;  %v3561_v9 = vpop.f32.mrf.mxu1 }
  0xfc   : > { %4599 = vst [vmem:[#allocation21_spill] sm:$0xff] %v3559_v8  ;;  %4600 = vst [vmem:[#allocation22_spill] sm:$0xff] %v3561_v9 }
  0xfd   : > { %v3563_v10 = vpop.f32.mrf.mxu0  ;;  %v3565_v11 = vpop.f32.mrf.mxu1 }
  0xfe   : > { %4601 = vst [vmem:[#allocation23_spill] sm:$0xff] %v3563_v10  ;;  %4602 = vst [vmem:[#allocation24_spill] sm:$0xff] %v3565_v11 }
  0xff   : > { %v3567_v12 = vpop.f32.mrf.mxu0  ;;  %v3569_v13 = vpop.f32.mrf.mxu1 }
 0x100   : > { %4603 = vst [vmem:[#allocation25_spill] sm:$0xff] %v3567_v12  ;;  %4604 = vst [vmem:[#allocation26_spill] sm:$0xff] %v3569_v13 }
 0x101   : > { %v3571_v14 = vpop.f32.mrf.mxu0  ;;  %v3573_v15 = vpop.f32.mrf.mxu1 }
 0x102   : > { %4605 = vst [vmem:[#allocation27_spill] sm:$0xff] %v3571_v14  ;;  %4606 = vst [vmem:[#allocation28_spill] sm:$0xff] %v3573_v15 }
 0x103   : > { %v3575_v16 = vpop.f32.mrf.mxu0  ;;  %v3577_v17 = vpop.f32.mrf.mxu1 }
 0x104   : > { %4607 = vst [vmem:[#allocation29_spill] sm:$0xff] %v3575_v16  ;;  %4608 = vst [vmem:[#allocation30_spill] sm:$0xff] %v3577_v17 }
 0x105   : > { %v3579_v18 = vpop.f32.mrf.mxu0  ;;  %v3581_v19 = vpop.f32.mrf.mxu1 }
 0x106   : > { %4609 = vst [vmem:[#allocation31_spill] sm:$0xff] %v3579_v18  ;;  %4610 = vst [vmem:[#allocation32_spill] sm:$0xff] %v3581_v19 }
 0x107   : > { %v3583_v20 = vpop.f32.mrf.mxu0  ;;  %v3585_v21 = vpop.f32.mrf.mxu1 }
 0x108   : > { %4611 = vst [vmem:[#allocation33_spill] sm:$0xff] %v3583_v20  ;;  %4612 = vst [vmem:[#allocation34_spill] sm:$0xff] %v3585_v21 }
 0x109   : > { %v3587_v22 = vpop.f32.mrf.mxu0  ;;  %v3589_v23 = vpop.f32.mrf.mxu1 }
 0x10a   : > { %4613 = vst [vmem:[#allocation35_spill] sm:$0xff] %v3587_v22  ;;  %4614 = vst [vmem:[#allocation36_spill] sm:$0xff] %v3589_v23 }
 0x10b   : > { %v3591_v24 = vpop.f32.mrf.mxu0  ;;  %v3593_v25 = vpop.f32.mrf.mxu1 }
 0x10c   : > { %4615 = vst [vmem:[#allocation37_spill] sm:$0xff] %v3591_v24  ;;  %4616 = vst [vmem:[#allocation38_spill] sm:$0xff] %v3593_v25 }
 0x10d   : > { %v3595_v26 = vpop.f32.mrf.mxu0  ;;  %v3597_v27 = vpop.f32.mrf.mxu1 }
 0x10e   : > { %4617 = vst [vmem:[#allocation39_spill] sm:$0xff] %v3597_v27 }
 0x10f   : > { %v3599_v28 = vpop.f32.mrf.mxu0  ;;  %v3601_v29 = vpop.f32.mrf.mxu1 }
 0x110   : > { %4618 = vst [vmem:[#allocation40_spill] sm:$0xff] %v3599_v28  ;;  %4619 = vst [vmem:[#allocation41_spill] sm:$0xff] %v3601_v29 }
 0x111   : > { %v3603_v30 = vpop.f32.mrf.mxu0  ;;  %v3605_v31 = vpop.f32.mrf.mxu1 }
 0x112   : > { %4620 = vst [vmem:[#allocation42_spill] sm:$0xff] %v3605_v31 }
 0x113   : > { %v3607_v32 = vpop.f32.mrf.mxu0  ;;  %v3609_v33 = vpop.f32.mrf.mxu1 }
 0x114   : > { %4621 = vst [vmem:[#allocation43_spill] sm:$0xff] %v3609_v33 }
 0x115   : > { %v3611_v34 = vpop.f32.mrf.mxu0  ;;  %v3613_v35 = vpop.f32.mrf.mxu1 }
 0x116   : > { %4622 = vst [vmem:[#allocation44_spill] sm:$0xff] %v3613_v35 }
 0x117   : > { %v3615_v36 = vpop.f32.mrf.mxu0  ;;  %v3617_v37 = vpop.f32.mrf.mxu1 }
 0x118   : > { %4623 = vst [vmem:[#allocation45_spill] sm:$0xff] %v3617_v37 }
 0x119   : > { %v3619_v38 = vpop.f32.mrf.mxu0  ;;  %v3621_v39 = vpop.f32.mrf.mxu1 }
 0x11a   : > { %4624 = vst [vmem:[#allocation46_spill] sm:$0xff] %v3621_v39 }
 0x11b   : > { %v3623_v40 = vpop.f32.mrf.mxu0  ;;  %v3625_v41 = vpop.f32.mrf.mxu1 }
 0x11c   : > { %4625 = vst [vmem:[#allocation47_spill] sm:$0xff] %v3625_v41 }
 0x11d   : > { %v3627_v42 = vpop.f32.mrf.mxu0  ;;  %v3629_v43 = vpop.f32.mrf.mxu1 }
 0x11e   : > { %4626 = vst [vmem:[#allocation48_spill] sm:$0xff] %v3629_v43 }
 0x11f   : > { %v3631_v44 = vpop.f32.mrf.mxu0  ;;  %v3633_v45 = vpop.f32.mrf.mxu1 }
 0x120   : > { %4627 = vst [vmem:[#allocation49_spill] sm:$0xff] %v3633_v45 }
 0x121   : > { %v3635_v46 = vpop.f32.mrf.mxu0  ;;  %v3637_v47 = vpop.f32.mrf.mxu1 }
 0x122   : > { %4628 = vst [vmem:[#allocation50_spill] sm:$0xff] %v3637_v47 }
 0x123   : > { %v3639_v48 = vpop.f32.mrf.mxu0  ;;  %v3641_v49 = vpop.f32.mrf.mxu1 }
 0x124   : > { %4629 = vst [vmem:[#allocation51_spill] sm:$0xff] %v3641_v49 }
 0x125   : > { %v3643_v50 = vpop.f32.mrf.mxu0  ;;  %v3645_v51 = vpop.f32.mrf.mxu1 }
 0x126   : > { %4630 = vst [vmem:[#allocation52_spill] sm:$0xff] %v3643_v50  ;;  %4631 = vst [vmem:[#allocation53_spill] sm:$0xff] %v3645_v51 }
 0x127   : > { %v3647_v52 = vpop.f32.mrf.mxu0  ;;  %v3649_v53 = vpop.f32.mrf.mxu1 }
 0x128   : > { %4632 = vst [vmem:[#allocation54_spill] sm:$0xff] %v3649_v53 }
 0x129   : > { %v3651_v54 = vpop.f32.mrf.mxu0  ;;  %v3653_v55 = vpop.f32.mrf.mxu1 }
 0x12a   : > { %4633 = vst [vmem:[#allocation55_spill] sm:$0xff] %v3653_v55 }
 0x12b   : > { %v3655_v56 = vpop.f32.mrf.mxu0  ;;  %v3657_v57 = vpop.f32.mrf.mxu1 }
 0x12c   : > { %4634 = vst [vmem:[#allocation56_spill] sm:$0xff] %v3657_v57 }
 0x12d   : > { %v3659_v47 = vpop.f32.mrf.mxu0  ;;  %v3661_v43 = vpop.f32.mrf.mxu1 }
 0x12e   : > { %4635 = vst [vmem:[#allocation57_spill] sm:$0xff] %v3661_v43 }
 0x12f   : > { %v3663_v49 = vpop.f32.mrf.mxu0  ;;  %v3665_v45 = vpop.f32.mrf.mxu1 }
 0x130   : > { %4636 = vst [vmem:[#allocation58_spill] sm:$0xff] %v3665_v45 }
 0x131   : > { %v3667_v51 = vpop.f32.mrf.mxu0  ;;  %v3669_v39 = vpop.f32.mrf.mxu1 }
 0x132   : > { %4637 = vst [vmem:[#allocation59_spill] sm:$0xff] %v3669_v39 }
 0x133   : > { %v3671_v53 = vpop.f32.mrf.mxu0  ;;  %v3673_v35 = vpop.f32.mrf.mxu1 }
 0x134   : > { %4638 = vst [vmem:[#allocation60_spill] sm:$0xff] %v3671_v53  ;;  %4639 = vst [vmem:[#allocation61_spill] sm:$0xff] %v3673_v35 }
 0x135   : > { %v3675_v55 = vpop.f32.mrf.mxu0  ;;  %v3677_v41 = vpop.f32.mrf.mxu1 }
 0x136   : > { %4640 = vst [vmem:[#allocation62_spill] sm:$0xff] %v3677_v41 }
 0x137   : > { %v3679_v57 = vpop.f32.mrf.mxu0  ;;  %v3681_v37 = vpop.f32.mrf.mxu1 }
 0x138   : > { %4641 = vst [vmem:[#allocation63_spill] sm:$0xff] %v3681_v37 }
 0x139   : > { %v3683_v43 = vpop.f32.mrf.mxu0  ;;  %v3685_v31 = vpop.f32.mrf.mxu1 }
 0x13a   : > { %4642 = vst [vmem:[#allocation64_spill] sm:$0xff] %v3685_v31 }
 0x13b   : > { %v3687_v45 = vpop.f32.mrf.mxu0  ;;  %v3689_v27 = vpop.f32.mrf.mxu1 }
 0x13c   : > { %4643 = vst [vmem:[#allocation65_spill] sm:$0xff] %v3689_v27 }
 0x13d   : > { %v3691_v39 = vpop.f32.mrf.mxu0  ;;  %v3693_v33 = vpop.f32.mrf.mxu1 }
 0x13e   : > { %4644 = vst [vmem:[#allocation66_spill] sm:$0xff] %v3691_v39  ;;  %4645 = vst [vmem:[#allocation67_spill] sm:$0xff] %v3693_v33 }
 0x13f   : > { %v3695_v35 = vpop.f32.mrf.mxu0  ;;  %v3697_v29 = vpop.f32.mrf.mxu1 }
 0x140   : > { %4646 = vst [vmem:[#allocation68_spill] sm:$0xff] %v3697_v29 }
 0x141   : > { %v3699_v41 = vpop.f32.mrf.mxu0  ;;  %v3701_v23 = vpop.f32.mrf.mxu1 }
 0x142   : > { %4647 = vst [vmem:[#allocation69_spill] sm:$0xff] %v3699_v41  ;;  %4648 = vst [vmem:[#allocation70_spill] sm:$0xff] %v3701_v23 }
 0x143   : > { %v3703_v37 = vpop.f32.mrf.mxu0  ;;  %v3705_v19 = vpop.f32.mrf.mxu1 }
 0x144   : > { %4649 = vst [vmem:[#allocation71_spill] sm:$0xff] %v3705_v19 }
 0x145   : > { %v3707_v31 = vpop.f32.mrf.mxu0  ;;  %v3709_v25 = vpop.f32.mrf.mxu1 }
 0x146   : > { %4650 = vst [vmem:[#allocation72_spill] sm:$0xff] %v3707_v31  ;;  %4651 = vst [vmem:[#allocation73_spill] sm:$0xff] %v3709_v25 }
 0x147   : > { %v3711_v27 = vpop.f32.mrf.mxu0  ;;  %v3713_v21 = vpop.f32.mrf.mxu1 }
 0x148   : > { %4652 = vst [vmem:[#allocation74_spill] sm:$0xff] %v3711_v27  ;;  %4653 = vst [vmem:[#allocation75_spill] sm:$0xff] %v3713_v21 }
 0x149   : > { %v3715_v33 = vpop.f32.mrf.mxu0  ;;  %v3717_v15 = vpop.f32.mrf.mxu1 }
 0x14a   : > { %4654 = vst [vmem:[#allocation76_spill] sm:$0xff] %v3715_v33  ;;  %4655 = vst [vmem:[#allocation77_spill] sm:$0xff] %v3717_v15 }
 0x14b   : > { %v3719_v29 = vpop.f32.mrf.mxu0  ;;  %v3721_v11 = vpop.f32.mrf.mxu1 }
 0x14c   : > { %4656 = vst [vmem:[#allocation78_spill] sm:$0xff] %v3719_v29  ;;  %4657 = vst [vmem:[#allocation79_spill] sm:$0xff] %v3721_v11 }
 0x14d   : > { %v3723_v23 = vpop.f32.mrf.mxu0 }
 0x14e   : > { %4658 = vst [vmem:[#allocation80_spill] sm:$0xff] %v3723_v23 }
 0x14f   : > { %v3725_v17 = vpop.f32.mrf.mxu0 }
 0x150   : > { %4659 = vst [vmem:[#allocation81_spill] sm:$0xff] %v3725_v17  ;;  %1092 = sbr.rel (%p2509_p4) target bundleno = 798 (0x31e), region = 36 }
 0x151   : > { %v3727_v19 = vpop.f32.mrf.mxu0 }
 0x152   : > { %4660 = vst [vmem:[#allocation82_spill] sm:$0xff] %v3727_v19 }
 0x153   : > { %v3729_v13 = vpop.f32.mrf.mxu0 }
 0x154   : > { %4661 = vst [vmem:[#allocation83_spill] sm:$0xff] %v3729_v13 }
 0x155   : > { %v1097_v25 = vadd.f32 %v3543_v0, %v3535_v60 }
 0x157   : > { %v1098_v15 = vadd.f32 %v3531_v58, %v1097_v25 }
 0x159   : > { %v1099_v21 = vadd.f32 %v3539_v62, %v1098_v15 }
 0x15b   : > { %v1100_v11 = vadd.f32 %v1099_v21, %v3551_v4 }
 0x15d   : > { %v1101_v7 = vadd.f32 %v1100_v11, %v3559_v8 }
 0x15f   : > { %v1102_v3 = vadd.f32 %v3547_v2, %v1101_v7 }
 0x161   : > { %v1103_v9 = vadd.f32 %v3555_v6, %v1102_v3 }
 0x163   : > { %v1104_v5 = vadd.f32 %v1103_v9, %v3567_v12 }
 0x165   : > { %v1105_v63 = vadd.f32 %v1104_v5, %v3575_v16 }
 0x167   : > { %v1106_v59 = vadd.f32 %v3563_v10, %v1105_v63 }
 0x169   : > { %v1107_v0 = vadd.f32 %v3571_v14, %v1106_v59 }
 0x16b   : > { %v1108_v25 = vadd.f32 %v1107_v0, %v3583_v20 }
 0x16d   : > { %v1109_v15 = vadd.f32 %v1108_v25, %v3591_v24 }
 0x16f   : > { %v1110_v21 = vadd.f32 %v3579_v18, %v1109_v15 }
 0x171   : > { %v1111_v11 = vadd.f32 %v3587_v22, %v1110_v21 }
 0x173   : > { %v1112_v7 = vadd.f32 %v1111_v11, %v3599_v28 }
 0x175   : > { %v1113_v3 = vadd.f32 %v1112_v7, %v3607_v32 }
 0x177   : > { %v1114_v9 = vadd.f32 %v3595_v26, %v1113_v3 }
 0x179   : > { %v1115_v5 = vadd.f32 %v3603_v30, %v1114_v9 }
 0x17b   : > { %v1116_v63 = vadd.f32 %v1115_v5, %v3615_v36 }
 0x17d   : > { %v1117_v59 = vadd.f32 %v1116_v63, %v3623_v40 }
 0x17f   : > { %v1118_v0 = vadd.f32 %v3611_v34, %v1117_v59 }
 0x181   : > { %v1119_v25 = vadd.f32 %v3619_v38, %v1118_v0 }
 0x183   : > { %v1120_v15 = vadd.f32 %v1119_v25, %v3631_v44 }
 0x185   : > { %v1121_v21 = vadd.f32 %v1120_v15, %v3639_v48 }
 0x187   : > { %v1122_v11 = vadd.f32 %v3627_v42, %v1121_v21 }
 0x189   : > { %v1123_v7 = vadd.f32 %v3635_v46, %v1122_v11 }
 0x18b   : > { %v1124_v3 = vadd.f32 %v1123_v7, %v3647_v52 }
 0x18d   : > { %v1125_v9 = vadd.f32 %v1124_v3, %v3655_v56 }
 0x18f   : > { %v1126_v5 = vadd.f32 %v3643_v50, %v1125_v9 }
 0x191   : > { %v1127_v63 = vadd.f32 %v3651_v54, %v1126_v5 }
 0x193   : > { %v1128_v59 = vadd.f32 %v1127_v63, %v3663_v49 }
 0x195   : > { %v1129_v0 = vadd.f32 %v1128_v59, %v3671_v53  ;;  %v3316_v53 = vmov 0.0  }
 0x196   : > { %1205 = vst [vmem:[#allocation3] sm:$0x1] %v3316_v53  ;;  %1206 = vst [vmem:[#allocation4] sm:$0x1] %v3316_v53 }
 0x197   : > { %v1130_v25 = vadd.f32 %v3659_v47, %v1129_v0 }
 0x199   : > { %v1131_v15 = vadd.f32 %v3667_v51, %v1130_v25 }
 0x19b   : > { %v1132_v21 = vadd.f32 %v1131_v15, %v3679_v57 }
 0x19d   : > { %v1133_v11 = vadd.f32 %v1132_v21, %v3687_v45 }
 0x19f   : > { %v1134_v7 = vadd.f32 %v3675_v55, %v1133_v11 }
 0x1a1   : > { %v1135_v3 = vadd.f32 %v3683_v43, %v1134_v7 }
 0x1a3   : > { %v1136_v9 = vadd.f32 %v1135_v3, %v3695_v35 }
 0x1a5   : > { %v1137_v5 = vadd.f32 %v1136_v9, %v3703_v37 }
 0x1a7   : > { %v1138_v63 = vadd.f32 %v3691_v39, %v1137_v5 }
 0x1a9   : > { %v1139_v59 = vadd.f32 %v3699_v41, %v1138_v63  ;;  %v4662_v63 = vld [vmem:[#allocation8_spill] sm:$0xff] }
 0x1ab   : > { %v1140_v0 = vadd.f32 %v1139_v59, %v3711_v27  ;;  %v4663_v27 = vld [vmem:[#allocation12_spill] sm:$0xff] }
 0x1ad   : > { %v1141_v25 = vadd.f32 %v1140_v0, %v3719_v29  ;;  %v4664_v29 = vld [vmem:[#allocation18_spill] sm:$0xff] }
 0x1af   : > { %v1142_v15 = vadd.f32 %v3707_v31, %v1141_v25  ;;  %v4665_v31 = vld [vmem:[#allocation22_spill] sm:$0xff] }
 0x1b1   : > { %v1143_v21 = vadd.f32 %v3715_v33, %v1142_v15  ;;  %v4666_v33 = vld [vmem:[#allocation16_spill] sm:$0xff] }
 0x1b3   : > { %v1144_v11 = vadd.f32 %v1143_v21, %v3725_v17  ;;  %v4667_v17 = vld [vmem:[#allocation20_spill] sm:$0xff] }
 0x1b5   : > { %v1145_v7 = vadd.f32 %v1144_v11, %v3729_v13  ;;  %v4668_v13 = vld [vmem:[#allocation26_spill] sm:$0xff] }
 0x1b7   : > { %v1146_v3 = vadd.f32 %v3723_v23, %v1145_v7  ;;  %v4669_v23 = vld [vmem:[#allocation30_spill] sm:$0xff] }
 0x1b9   : > { %v1147_v9 = vadd.f32 %v3727_v19, %v1146_v3  ;;  %v4670_v19 = vld [vmem:[#allocation24_spill] sm:$0xff] }
 0x1bb   : > { %v1148_v5 = vadd.f32 %v1147_v9, %v3537_v61  ;;  %v4671_v61 = vld [vmem:[#allocation28_spill] sm:$0xff] }
 0x1bd   : > { %v1149_v53 = vadd.f32 %v1148_v5, %v3545_v1  ;;  %v4672_v1 = vld [vmem:[#allocation34_spill] sm:$0xff] }
 0x1bf   : > { %v1150_v59 = vadd.f32 %v4662_v63, %v1149_v53  ;;  %v4673_v63 = vld [vmem:[#allocation38_spill] sm:$0xff] }
 0x1c1   : > { %v1151_v0 = vadd.f32 %v4663_v27, %v1150_v59  ;;  %v4674_v27 = vld [vmem:[#allocation32_spill] sm:$0xff] }
 0x1c3   : > { %v1152_v25 = vadd.f32 %v1151_v0, %v4664_v29  ;;  %v4675_v29 = vld [vmem:[#allocation36_spill] sm:$0xff] }
 0x1c5   : > { %v1153_v15 = vadd.f32 %v1152_v25, %v4665_v31  ;;  %v4676_v31 = vld [vmem:[#allocation41_spill] sm:$0xff] }
 0x1c7   : > { %v1154_v21 = vadd.f32 %v4666_v33, %v1153_v15  ;;  %v4677_v33 = vld [vmem:[#allocation43_spill] sm:$0xff] }
 0x1c9   : > { %v1155_v11 = vadd.f32 %v4667_v17, %v1154_v21  ;;  %v4678_v17 = vld [vmem:[#allocation39_spill] sm:$0xff] }
 0x1cb   : > { %v1156_v7 = vadd.f32 %v1155_v11, %v4668_v13  ;;  %v4679_v13 = vld [vmem:[#allocation42_spill] sm:$0xff] }
 0x1cd   : > { %v1157_v3 = vadd.f32 %v1156_v7, %v4669_v23  ;;  %v4680_v23 = vld [vmem:[#allocation45_spill] sm:$0xff] }
 0x1cf   : > { %v1158_v9 = vadd.f32 %v4670_v19, %v1157_v3  ;;  %v4681_v19 = vld [vmem:[#allocation47_spill] sm:$0xff] }
 0x1d1   : > { %v1159_v5 = vadd.f32 %v4671_v61, %v1158_v9  ;;  %v4682_v61 = vld [vmem:[#allocation44_spill] sm:$0xff] }
 0x1d3   : > { %v1160_v53 = vadd.f32 %v1159_v5, %v4672_v1  ;;  %v4683_v1 = vld [vmem:[#allocation46_spill] sm:$0xff] }
 0x1d5   : > { %v1161_v59 = vadd.f32 %v1160_v53, %v4673_v63  ;;  %v4684_v63 = vld [vmem:[#allocation49_spill] sm:$0xff] }
 0x1d7   : > { %v1162_v0 = vadd.f32 %v4674_v27, %v1161_v59  ;;  %v4685_v27 = vld [vmem:[#allocation51_spill] sm:$0xff] }
 0x1d9   : > { %v1163_v25 = vadd.f32 %v4675_v29, %v1162_v0  ;;  %v4686_v29 = vld [vmem:[#allocation48_spill] sm:$0xff] }
 0x1db   : > { %v1164_v15 = vadd.f32 %v1163_v25, %v4676_v31  ;;  %v4687_v31 = vld [vmem:[#allocation50_spill] sm:$0xff] }
 0x1dd   : > { %v1165_v21 = vadd.f32 %v1164_v15, %v4677_v33  ;;  %v4688_v33 = vld [vmem:[#allocation54_spill] sm:$0xff] }
 0x1df   : > { %v1166_v11 = vadd.f32 %v4678_v17, %v1165_v21  ;;  %v4689_v17 = vld [vmem:[#allocation56_spill] sm:$0xff] }
 0x1e1   : > { %v1167_v7 = vadd.f32 %v4679_v13, %v1166_v11  ;;  %v4690_v13 = vld [vmem:[#allocation53_spill] sm:$0xff] }
 0x1e3   : > { %v1168_v3 = vadd.f32 %v1167_v7, %v4680_v23  ;;  %v4691_v23 = vld [vmem:[#allocation55_spill] sm:$0xff] }
 0x1e5   : > { %v1169_v9 = vadd.f32 %v1168_v3, %v4681_v19  ;;  %v4692_v19 = vld [vmem:[#allocation58_spill] sm:$0xff] }
 0x1e7   : > { %v1170_v5 = vadd.f32 %v4682_v61, %v1169_v9  ;;  %v4693_v61 = vld [vmem:[#allocation61_spill] sm:$0xff] }
 0x1e9   : > { %v1171_v53 = vadd.f32 %v4683_v1, %v1170_v5  ;;  %v4694_v1 = vld [vmem:[#allocation57_spill] sm:$0xff] }
 0x1eb   : > { %v1172_v59 = vadd.f32 %v1171_v53, %v4684_v63  ;;  %v4695_v63 = vld [vmem:[#allocation59_spill] sm:$0xff] }
 0x1ed   : > { %v1173_v0 = vadd.f32 %v1172_v59, %v4685_v27  ;;  %v4696_v27 = vld [vmem:[#allocation63_spill] sm:$0xff] }
 0x1ef   : > { %v1174_v25 = vadd.f32 %v4686_v29, %v1173_v0  ;;  %v4697_v29 = vld [vmem:[#allocation65_spill] sm:$0xff] }
 0x1f1   : > { %v1175_v15 = vadd.f32 %v4687_v31, %v1174_v25  ;;  %v4698_v31 = vld [vmem:[#allocation62_spill] sm:$0xff] }
 0x1f3   : > { %v1176_v21 = vadd.f32 %v1175_v15, %v4688_v33  ;;  %v4699_v33 = vld [vmem:[#allocation64_spill] sm:$0xff] }
 0x1f5   : > { %v1177_v11 = vadd.f32 %v1176_v21, %v4689_v17  ;;  %v4700_v17 = vld [vmem:[#allocation68_spill] sm:$0xff] }
 0x1f7   : > { %v1178_v7 = vadd.f32 %v4690_v13, %v1177_v11  ;;  %v4701_v13 = vld [vmem:[#allocation71_spill] sm:$0xff] }
 0x1f9   : > { %v1179_v3 = vadd.f32 %v4691_v23, %v1178_v7  ;;  %v4702_v23 = vld [vmem:[#allocation67_spill] sm:$0xff] }
 0x1fb   : > { %v1180_v9 = vadd.f32 %v1179_v3, %v4692_v19  ;;  %v4703_v19 = vld [vmem:[#allocation70_spill] sm:$0xff] }
 0x1fd   : > { %v1181_v5 = vadd.f32 %v1180_v9, %v4693_v61  ;;  %v4704_v61 = vld [vmem:[#allocation75_spill] sm:$0xff] }
 0x1ff   : > { %v1182_v53 = vadd.f32 %v4694_v1, %v1181_v5  ;;  %v4705_v1 = vld [vmem:[#allocation79_spill] sm:$0xff] }
 0x201   : > { %v1183_v59 = vadd.f32 %v4695_v63, %v1182_v53  ;;  %v4706_v63 = vld [vmem:[#allocation73_spill] sm:$0xff] }
 0x203   : > { %v1184_v0 = vadd.f32 %v1183_v59, %v4696_v27  ;;  %v4707_v27 = vld [vmem:[#allocation77_spill] sm:$0xff] }
 0x205   : > { %v1185_v25 = vadd.f32 %v1184_v0, %v4697_v29 }
 0x207   : > { %v1186_v15 = vadd.f32 %v4698_v31, %v1185_v25 }
 0x209   : > { %v1187_v21 = vadd.f32 %v4699_v33, %v1186_v15 }
 0x20b   : > { %v1188_v11 = vadd.f32 %v1187_v21, %v4700_v17 }
 0x20d   : > { %v1189_v7 = vadd.f32 %v1188_v11, %v4701_v13 }
 0x20f   : > { %v1190_v3 = vadd.f32 %v4702_v23, %v1189_v7 }
 0x211   : > { %v1191_v9 = vadd.f32 %v4703_v19, %v1190_v3  ;;  %v4708_v3 = vld [vmem:[#allocation13_spill] sm:$0xff] }
 0x213   : > { %v1192_v5 = vadd.f32 %v1191_v9, %v4704_v61 }
 0x215   : > { %v1193_v53 = vadd.f32 %v1192_v5, %v4705_v1 }
 0x217   : > { %v1194_v59 = vadd.f32 %v4706_v63, %v1193_v53 }
 0x219   : > { %v1195_v0 = vadd.f32 %v4707_v27, %v1194_v59 }
 0x21b   : > { %v1196_v29 = vrot.slane %v1195_v0, 4 }
 0x21d   : > { %v1197_v25 = vadd.f32 %v1196_v29, %v1195_v0 }
 0x21f   : > { %v1198_v31 = vrot.slane %v1197_v25, 2 }
 0x221   : > { %v1199_v15 = vadd.f32 %v1198_v31, %v1197_v25 }
 0x223   : > { %v1200_v33 = vrot.slane %v1199_v15, 1 }
 0x225   : > { %v1201_v21 = vadd.f32 %v1200_v33, %v1199_v15 }
 0x227   : > { %v1203_v17 = vmul.f32 0.00125, %v1201_v21 }
 0x229   : > { %1204 = vst [vmem:[#allocation2] sm:$0x1] %v1203_v17 }
 0x230   : > { %v3832_v11 = vld [vmem:[#allocation2] ss:$0 sm:$0xff] }
 0x231   : > { %v1214_v7 = vsub.f32 %v3535_v60, %v3832_v11  ;;  %v1215_v9 = vsub.f32 %v4708_v3, %v3832_v11  ;;  %v1216_v5 = vsub.f32 %v3531_v58, %v3832_v11  ;;  %v1217_v29 = vsub.f32 %v3539_v62, %v3832_v11 }
 0x232   : > { %v1218_v33 = vsub.f32 %v3551_v4, %v3832_v11  ;;  %v1219_v59 = vsub.f32 %v3559_v8, %v3832_v11  ;;  %v1220_v25 = vsub.f32 %v3547_v2, %v3832_v11  ;;  %v1221_v21 = vsub.f32 %v3555_v6, %v3832_v11 }
 0x233   : > { %v1315_v53 = vadd.f32 %v1215_v9, %v1214_v7  ;;  %v1222_v62 = vsub.f32 %v3567_v12, %v3832_v11  ;;  %v1223_v4 = vsub.f32 %v3575_v16, %v3832_v11  ;;  %v1224_v8 = vsub.f32 %v3563_v10, %v3832_v11 }
 0x234   : > { %v1225_v2 = vsub.f32 %v3571_v14, %v3832_v11  ;;  %v1226_v6 = vsub.f32 %v3583_v20, %v3832_v11  ;;  %v1227_v12 = vsub.f32 %v3591_v24, %v3832_v11  ;;  %v1228_v16 = vsub.f32 %v3579_v18, %v3832_v11 }
 0x235   : > { %v1316_v31 = vadd.f32 %v1315_v53, %v1216_v5  ;;  %v1423_v58 = vmul.f32 %v1214_v7, %v1214_v7  ;;  %v1424_v60 = vmul.f32 %v1215_v9, %v1215_v9  ;;  %v1425_v20 = vmul.f32 %v1216_v5, %v1216_v5 }
 0x236   : > { %v1231_v24 = vsub.f32 %v3607_v32, %v3832_v11  ;;  %v1426_v27 = vmul.f32 %v1217_v29, %v1217_v29  ;;  %v1232_v7 = vsub.f32 %v3595_v26, %v3832_v11  ;;  %v1429_v5 = vmul.f32 %v1220_v25, %v1220_v25 }
 0x237   : > { %v1317_v17 = vadd.f32 %v1316_v31, %v1217_v29 }
 0x239   : > { %v1318_v0 = vadd.f32 %v1317_v17, %v1218_v33 }
 0x23b   : > { %v1319_v15 = vadd.f32 %v1318_v0, %v1219_v59 }
 0x23d   : > { %v1320_v3 = vadd.f32 %v1319_v15, %v1220_v25 }
 0x23f   : > { %v1321_v53 = vadd.f32 %v1320_v3, %v1221_v21 }
 0x241   : > { %v1322_v31 = vadd.f32 %v1321_v53, %v1222_v62 }
 0x243   : > { %v1323_v17 = vadd.f32 %v1322_v31, %v1223_v4  ;;  %v1229_v31 = vsub.f32 %v3587_v22, %v3832_v11 }
 0x245   : > { %v1324_v0 = vadd.f32 %v1323_v17, %v1224_v8  ;;  %v1230_v17 = vsub.f32 %v3599_v28, %v3832_v11  ;;  %v1428_v28 = vmul.f32 %v1219_v59, %v1219_v59 }
 0x247   : > { %v1325_v15 = vadd.f32 %v1324_v0, %v1225_v2  ;;  %v1523_v0 = vadd.f32 %v1424_v60, %v1423_v58  ;;  %v1234_v58 = vsub.f32 %v3615_v36, %v3832_v11 }
 0x249   : > { %v1326_v3 = vadd.f32 %v1325_v15, %v1226_v6  ;;  %v1524_v63 = vadd.f32 %v1523_v0, %v1425_v20  ;;  %v1235_v20 = vsub.f32 %v3623_v40, %v3832_v11  ;;  %v1430_v0 = vmul.f32 %v1221_v21, %v1221_v21 }
 0x24a   : > { %v1239_v21 = vsub.f32 %v3639_v48, %v3832_v11 }
 0x24b   : > { %v1327_v53 = vadd.f32 %v1326_v3, %v1227_v12  ;;  %v1427_v3 = vmul.f32 %v1218_v33, %v1218_v33  ;;  %v1525_v18 = vadd.f32 %v1524_v63, %v1426_v27  ;;  %v1236_v27 = vsub.f32 %v3611_v34, %v3832_v11 }
 0x24c   : > { %v1431_v33 = vmul.f32 %v1222_v62, %v1222_v62  ;;  %v1240_v62 = vsub.f32 %v3627_v42, %v3832_v11 }
 0x24d   : > { %v1328_v10 = vadd.f32 %v1327_v53, %v1228_v16  ;;  %v1233_v53 = vsub.f32 %v3603_v30, %v3832_v11 }
 0x24f   : > { %v1329_v14 = vadd.f32 %v1328_v10, %v1229_v31  ;;  %v1526_v10 = vadd.f32 %v1525_v18, %v1427_v3  ;;  %v1237_v18 = vsub.f32 %v3619_v38, %v3832_v11  ;;  %v1432_v3 = vmul.f32 %v1223_v4, %v1223_v4 }
 0x250   : > { %v1241_v4 = vsub.f32 %v3635_v46, %v3832_v11 }
 0x251   : > { %v1330_v15 = vadd.f32 %v1329_v14, %v1230_v17  ;;  %v1527_v14 = vadd.f32 %v1526_v10, %v1428_v28  ;;  %v1238_v28 = vsub.f32 %v3631_v44, %v3832_v11  ;;  %v1433_v10 = vmul.f32 %v1224_v8, %v1224_v8 }
 0x252   : > { %v1242_v8 = vsub.f32 %v3647_v52, %v3832_v11 }
 0x253   : > { %v1331_v9 = vadd.f32 %v1330_v15, %v1231_v24  ;;  %v1528_v15 = vadd.f32 %v1527_v14, %v1429_v5  ;;  %v1434_v14 = vmul.f32 %v1225_v2, %v1225_v2  ;;  %v1243_v2 = vsub.f32 %v3655_v56, %v3832_v11 }
 0x255   : > { %v1332_v22 = vadd.f32 %v1331_v9, %v1232_v7  ;;  %v1529_v9 = vadd.f32 %v1528_v15, %v1430_v0  ;;  %v1435_v15 = vmul.f32 %v1226_v6, %v1226_v6  ;;  %v1244_v6 = vsub.f32 %v3643_v50, %v3832_v11 }
 0x256   : > { %v1442_v50 = vmul.f32 %v1233_v53, %v1233_v53 }
 0x257   : > { %v1333_v60 = vadd.f32 %v1332_v22, %v1233_v53  ;;  %v1530_v22 = vadd.f32 %v1529_v9, %v1431_v33  ;;  %v1436_v9 = vmul.f32 %v1227_v12, %v1227_v12  ;;  %v1245_v12 = vsub.f32 %v3651_v54, %v3832_v11 }
 0x258   : > { %v1251_v53 = vsub.f32 %v3687_v45, %v3832_v11 }
 0x259   : > { %v1334_v29 = vadd.f32 %v1333_v60, %v1234_v58  ;;  %v1531_v60 = vadd.f32 %v1530_v22, %v1432_v3  ;;  %v1437_v22 = vmul.f32 %v1228_v16, %v1228_v16  ;;  %v1246_v16 = vsub.f32 %v3663_v49, %v3832_v11 }
 0x25b   : > { %v1335_v63 = vadd.f32 %v1334_v29, %v1235_v20  ;;  %v1532_v29 = vadd.f32 %v1531_v60, %v1433_v10  ;;  %v1438_v60 = vmul.f32 %v1229_v31, %v1229_v31  ;;  %v4709_v31 = vld [vmem:[#allocation60_spill] sm:$0xff] }
 0x25d   : > { %v1336_v59 = vadd.f32 %v1335_v63, %v1236_v27  ;;  %v1533_v63 = vadd.f32 %v1532_v29, %v1434_v14  ;;  %v1439_v29 = vmul.f32 %v1230_v17, %v1230_v17  ;;  %v1248_v17 = vsub.f32 %v3659_v47, %v3832_v11 }
 0x25f   : > { %v1337_v25 = vadd.f32 %v1336_v59, %v1237_v18  ;;  %v1534_v59 = vadd.f32 %v1533_v63, %v1435_v15  ;;  %v1440_v63 = vmul.f32 %v1231_v24, %v1231_v24  ;;  %v1249_v24 = vsub.f32 %v3667_v51, %v3832_v11 }
 0x261   : > { %v1338_v5 = vadd.f32 %v1337_v25, %v1238_v28  ;;  %v1535_v25 = vadd.f32 %v1534_v59, %v1436_v9  ;;  %v1441_v59 = vmul.f32 %v1232_v7, %v1232_v7  ;;  %v1250_v7 = vsub.f32 %v3679_v57, %v3832_v11 }
 0x263   : > { %v1339_v0 = vadd.f32 %v1338_v5, %v1239_v21  ;;  %v1536_v5 = vadd.f32 %v1535_v25, %v1437_v22  ;;  %v1247_v22 = vsub.f32 %v4709_v31, %v3832_v11 }
 0x265   : > { %v1340_v33 = vadd.f32 %v1339_v0, %v1240_v62  ;;  %v1537_v0 = vadd.f32 %v1536_v5, %v1438_v60  ;;  %v1443_v5 = vmul.f32 %v1234_v58, %v1234_v58 }
 0x267   : > { %v1341_v3 = vadd.f32 %v1340_v33, %v1241_v4  ;;  %v1538_v33 = vadd.f32 %v1537_v0, %v1439_v29  ;;  %v1444_v0 = vmul.f32 %v1235_v20, %v1235_v20  ;;  %v1253_v20 = vsub.f32 %v3683_v43, %v3832_v11 }
 0x269   : > { %v1342_v10 = vadd.f32 %v1341_v3, %v1242_v8  ;;  %v1539_v3 = vadd.f32 %v1538_v33, %v1440_v63  ;;  %v1445_v33 = vmul.f32 %v1236_v27, %v1236_v27  ;;  %v1254_v27 = vsub.f32 %v3695_v35, %v3832_v11 }
 0x26b   : > { %v1343_v14 = vadd.f32 %v1342_v10, %v1243_v2  ;;  %v1540_v10 = vadd.f32 %v1539_v3, %v1441_v59  ;;  %v1446_v3 = vmul.f32 %v1237_v18, %v1237_v18  ;;  %v1255_v18 = vsub.f32 %v3703_v37, %v3832_v11 }
 0x26d   : > { %v1344_v15 = vadd.f32 %v1343_v14, %v1244_v6  ;;  %v1541_v14 = vadd.f32 %v1540_v10, %v1442_v50  ;;  %v1252_v50 = vsub.f32 %v3675_v55, %v3832_v11 }
 0x26f   : > { %v1345_v9 = vadd.f32 %v1344_v15, %v1245_v12  ;;  %v1542_v15 = vadd.f32 %v1541_v14, %v1443_v5  ;;  %v1448_v5 = vmul.f32 %v1239_v21, %v1239_v21  ;;  %v1257_v21 = vsub.f32 %v3699_v41, %v3832_v11 }
 0x270   : > { %v1455_v41 = vmul.f32 %v1246_v16, %v1246_v16 }
 0x271   : > { %v1346_v25 = vadd.f32 %v1345_v9, %v1246_v16  ;;  %v1543_v9 = vadd.f32 %v1542_v15, %v1444_v0  ;;  %v1449_v0 = vmul.f32 %v1240_v62, %v1240_v62  ;;  %v4710_v62 = vld [vmem:[#allocation74_spill] sm:$0xff] }
 0x273   : > { %v1347_v60 = vadd.f32 %v1346_v25, %v1247_v22  ;;  %v1544_v31 = vadd.f32 %v1543_v9, %v1445_v33  ;;  %v1447_v25 = vmul.f32 %v1238_v28, %v1238_v28  ;;  %v1450_v33 = vmul.f32 %v1241_v4, %v1241_v4  ;;  %v4711_v4 = vld [vmem:[#allocation78_spill] sm:$0xff] }
 0x274   : > { %v1256_v28 = vsub.f32 %v3691_v39, %v3832_v11  ;;  %v1454_v39 = vmul.f32 %v1245_v12, %v1245_v12  ;;  %v4715_v12 = vld [vmem:[#allocation83_spill] sm:$0xff] }
 0x275   : > { %v1348_v29 = vadd.f32 %v1347_v60, %v1248_v17  ;;  %v1545_v10 = vadd.f32 %v1544_v31, %v1446_v3  ;;  %v1451_v3 = vmul.f32 %v1242_v8, %v1242_v8  ;;  %v4712_v8 = vld [vmem:[#allocation72_spill] sm:$0xff] }
 0x277   : > { %v1349_v63 = vadd.f32 %v1348_v29, %v1249_v24  ;;  %v1546_v14 = vadd.f32 %v1545_v10, %v1447_v25  ;;  %v1452_v25 = vmul.f32 %v1243_v2, %v1243_v2  ;;  %v4713_v2 = vld [vmem:[#allocation76_spill] sm:$0xff] }
 0x279   : > { %v1350_v59 = vadd.f32 %v1349_v63, %v1250_v7  ;;  %v1547_v15 = vadd.f32 %v1546_v14, %v1448_v5  ;;  %v1453_v14 = vmul.f32 %v1244_v6, %v1244_v6  ;;  %v4714_v6 = vld [vmem:[#allocation81_spill] sm:$0xff] }
 0x27b   : > { %v1351_v58 = vadd.f32 %v1350_v59, %v1251_v53  ;;  %v1548_v9 = vadd.f32 %v1547_v15, %v1449_v0  ;;  %v1259_v0 = vsub.f32 %v4711_v4, %v3832_v11  ;;  %v1457_v4 = vmul.f32 %v1248_v17, %v1248_v17  ;;  %v4718_v17 = vld [vmem:[#allocation10_spill] sm:$0xff] }
 0x27d   : > { %v1352_v60 = vadd.f32 %v1351_v58, %v1252_v50  ;;  %v1549_v31 = vadd.f32 %v1548_v9, %v1450_v33  ;;  %v1260_v33 = vsub.f32 %v4712_v8, %v3832_v11  ;;  %v1458_v8 = vmul.f32 %v1249_v24, %v1249_v24  ;;  %v4719_v24 = vld [vmem:[#allocation14_spill] sm:$0xff] }
 0x27f   : > { %v1353_v29 = vadd.f32 %v1352_v60, %v1253_v20  ;;  %v1550_v10 = vadd.f32 %v1549_v31, %v1451_v3  ;;  %v1258_v60 = vsub.f32 %v4710_v62, %v3832_v11  ;;  %v1261_v3 = vsub.f32 %v4713_v2, %v3832_v11 }
 0x280   : > { %v1456_v62 = vmul.f32 %v1247_v22, %v1247_v22  ;;  %v1459_v2 = vmul.f32 %v1250_v7, %v1250_v7  ;;  %v4720_v7 = vld [vmem:[#allocation8_spill] sm:$0xff] }
 0x281   : > { %v1354_v63 = vadd.f32 %v1353_v29, %v1254_v27  ;;  %v1551_v29 = vadd.f32 %v1550_v10, %v1452_v25  ;;  %v1262_v25 = vsub.f32 %v4714_v6, %v3832_v11  ;;  %v1460_v6 = vmul.f32 %v1251_v53, %v1251_v53  ;;  %v4721_v53 = vld [vmem:[#allocation12_spill] sm:$0xff] }
 0x283   : > { %v1355_v59 = vadd.f32 %v1354_v63, %v1255_v18  ;;  %v1552_v63 = vadd.f32 %v1551_v29, %v1453_v14  ;;  %v1263_v14 = vsub.f32 %v4715_v12, %v3832_v11  ;;  %v1461_v12 = vmul.f32 %v1252_v50, %v1252_v50  ;;  %v4722_v50 = vld [vmem:[#allocation18_spill] sm:$0xff] }
 0x285   : > { %v1356_v58 = vadd.f32 %v1355_v59, %v1256_v28  ;;  %v1553_v59 = vadd.f32 %v1552_v63, %v1454_v39  ;;  %v4716_v39 = vld [vmem:[#allocation80_spill] sm:$0xff] }
 0x286   : > { %v1264_v16 = vsub.f32 %v4716_v39, %v3832_v11  ;;  %v1462_v39 = vmul.f32 %v1253_v20, %v1253_v20  ;;  %v4723_v20 = vld [vmem:[#allocation22_spill] sm:$0xff] }
 0x287   : > { %v1357_v5 = vadd.f32 %v1356_v58, %v1257_v21  ;;  %v1554_v58 = vadd.f32 %v1553_v59, %v1455_v41  ;;  %v4717_v41 = vld [vmem:[#allocation82_spill] sm:$0xff] }
 0x288   : > { %v1265_v22 = vsub.f32 %v4717_v41, %v3832_v11  ;;  %v1463_v41 = vmul.f32 %v1254_v27, %v1254_v27  ;;  %v4724_v27 = vld [vmem:[#allocation16_spill] sm:$0xff] }
 0x289   : > { %v1358_v15 = vadd.f32 %v1357_v5, %v1258_v60  ;;  %v1555_v5 = vadd.f32 %v1554_v58, %v1456_v62  ;;  %v1266_v62 = vsub.f32 %v4718_v17, %v3832_v11  ;;  %v1464_v17 = vmul.f32 %v1255_v18, %v1255_v18  ;;  %v4725_v18 = vld [vmem:[#allocation20_spill] sm:$0xff] }
 0x28b   : > { %v1359_v9 = vadd.f32 %v1358_v15, %v1259_v0  ;;  %v1556_v15 = vadd.f32 %v1555_v5, %v1457_v4  ;;  %v1267_v4 = vsub.f32 %v4719_v24, %v3832_v11  ;;  %v1465_v24 = vmul.f32 %v1256_v28, %v1256_v28  ;;  %v4726_v28 = vld [vmem:[#allocation26_spill] sm:$0xff] }
 0x28d   : > { %v1360_v31 = vadd.f32 %v1359_v9, %v1260_v33  ;;  %v1557_v9 = vadd.f32 %v1556_v15, %v1458_v8  ;;  %v1268_v8 = vsub.f32 %v4720_v7, %v3832_v11  ;;  %v1466_v7 = vmul.f32 %v1257_v21, %v1257_v21  ;;  %v4727_v21 = vld [vmem:[#allocation30_spill] sm:$0xff] }
 0x28f   : > { %v1361_v10 = vadd.f32 %v1360_v31, %v1261_v3  ;;  %v1558_v31 = vadd.f32 %v1557_v9, %v1459_v2  ;;  %v1269_v2 = vsub.f32 %v4721_v53, %v3832_v11  ;;  %v1467_v53 = vmul.f32 %v1258_v60, %v1258_v60  ;;  %v4728_v60 = vld [vmem:[#allocation24_spill] sm:$0xff] }
 0x291   : > { %v1362_v29 = vadd.f32 %v1361_v10, %v1262_v25  ;;  %v1559_v10 = vadd.f32 %v1558_v31, %v1460_v6  ;;  %v1270_v6 = vsub.f32 %v4722_v50, %v3832_v11  ;;  %v1468_v50 = vmul.f32 %v1259_v0, %v1259_v0  ;;  %v4729_v0 = vld [vmem:[#allocation28_spill] sm:$0xff] }
 0x293   : > { %v1363_v63 = vadd.f32 %v1362_v29, %v1263_v14  ;;  %v1560_v29 = vadd.f32 %v1559_v10, %v1461_v12  ;;  %v1271_v12 = vsub.f32 %v4723_v20, %v3832_v11  ;;  %v1469_v20 = vmul.f32 %v1260_v33, %v1260_v33  ;;  %v4730_v33 = vld [vmem:[#allocation34_spill] sm:$0xff] }
 0x295   : > { %v1364_v59 = vadd.f32 %v1363_v63, %v1264_v16  ;;  %v1561_v63 = vadd.f32 %v1560_v29, %v1462_v39  ;;  %v1272_v39 = vsub.f32 %v4724_v27, %v3832_v11  ;;  %v1470_v27 = vmul.f32 %v1261_v3, %v1261_v3  ;;  %v4731_v3 = vld [vmem:[#allocation38_spill] sm:$0xff] }
 0x297   : > { %v1365_v58 = vadd.f32 %v1364_v59, %v1265_v22  ;;  %v1562_v59 = vadd.f32 %v1561_v63, %v1463_v41  ;;  %v1273_v41 = vsub.f32 %v4725_v18, %v3832_v11  ;;  %v1471_v18 = vmul.f32 %v1262_v25, %v1262_v25  ;;  %v4732_v25 = vld [vmem:[#allocation32_spill] sm:$0xff] }
 0x299   : > { %v1366_v5 = vadd.f32 %v1365_v58, %v1266_v62  ;;  %v1563_v58 = vadd.f32 %v1562_v59, %v1464_v17  ;;  %v1274_v17 = vsub.f32 %v4726_v28, %v3832_v11  ;;  %v1472_v28 = vmul.f32 %v1263_v14, %v1263_v14  ;;  %v4733_v14 = vld [vmem:[#allocation36_spill] sm:$0xff] }
 0x29b   : > { %v1367_v15 = vadd.f32 %v1366_v5, %v1267_v4  ;;  %v1564_v5 = vadd.f32 %v1563_v58, %v1465_v24  ;;  %v1275_v24 = vsub.f32 %v4727_v21, %v3832_v11  ;;  %v1473_v21 = vmul.f32 %v1264_v16, %v1264_v16  ;;  %v4734_v16 = vld [vmem:[#allocation41_spill] sm:$0xff] }
 0x29d   : > { %v1368_v9 = vadd.f32 %v1367_v15, %v1268_v8  ;;  %v1565_v15 = vadd.f32 %v1564_v5, %v1466_v7  ;;  %v1276_v7 = vsub.f32 %v4728_v60, %v3832_v11  ;;  %v1474_v60 = vmul.f32 %v1265_v22, %v1265_v22  ;;  %v4735_v22 = vld [vmem:[#allocation43_spill] sm:$0xff] }
 0x29f   : > { %v1369_v31 = vadd.f32 %v1368_v9, %v1269_v2  ;;  %v1566_v9 = vadd.f32 %v1565_v15, %v1467_v53  ;;  %v1277_v53 = vsub.f32 %v4729_v0, %v3832_v11  ;;  %v1475_v0 = vmul.f32 %v1266_v62, %v1266_v62  ;;  %v4736_v62 = vld [vmem:[#allocation39_spill] sm:$0xff] }
 0x2a1   : > { %v1370_v10 = vadd.f32 %v1369_v31, %v1270_v6  ;;  %v1567_v31 = vadd.f32 %v1566_v9, %v1468_v50  ;;  %v1278_v50 = vsub.f32 %v4730_v33, %v3832_v11  ;;  %v1476_v33 = vmul.f32 %v1267_v4, %v1267_v4  ;;  %v4737_v4 = vld [vmem:[#allocation42_spill] sm:$0xff] }
 0x2a3   : > { %v1371_v29 = vadd.f32 %v1370_v10, %v1271_v12  ;;  %v1568_v10 = vadd.f32 %v1567_v31, %v1469_v20  ;;  %v1279_v20 = vsub.f32 %v4731_v3, %v3832_v11  ;;  %v1477_v3 = vmul.f32 %v1268_v8, %v1268_v8  ;;  %v4738_v8 = vld [vmem:[#allocation45_spill] sm:$0xff] }
 0x2a5   : > { %v1372_v63 = vadd.f32 %v1371_v29, %v1272_v39  ;;  %v1569_v29 = vadd.f32 %v1568_v10, %v1470_v27  ;;  %v1280_v27 = vsub.f32 %v4732_v25, %v3832_v11  ;;  %v1478_v25 = vmul.f32 %v1269_v2, %v1269_v2  ;;  %v4739_v2 = vld [vmem:[#allocation47_spill] sm:$0xff] }
 0x2a7   : > { %v1373_v59 = vadd.f32 %v1372_v63, %v1273_v41  ;;  %v1570_v63 = vadd.f32 %v1569_v29, %v1471_v18  ;;  %v1281_v18 = vsub.f32 %v4733_v14, %v3832_v11  ;;  %v1479_v14 = vmul.f32 %v1270_v6, %v1270_v6  ;;  %v4740_v6 = vld [vmem:[#allocation44_spill] sm:$0xff] }
 0x2a9   : > { %v1374_v58 = vadd.f32 %v1373_v59, %v1274_v17  ;;  %v1571_v59 = vadd.f32 %v1570_v63, %v1472_v28  ;;  %v1282_v28 = vsub.f32 %v4734_v16, %v3832_v11  ;;  %v1480_v16 = vmul.f32 %v1271_v12, %v1271_v12  ;;  %v4741_v12 = vld [vmem:[#allocation46_spill] sm:$0xff] }
 0x2ab   : > { %v1375_v5 = vadd.f32 %v1374_v58, %v1275_v24  ;;  %v1572_v58 = vadd.f32 %v1571_v59, %v1473_v21  ;;  %v1283_v21 = vsub.f32 %v4735_v22, %v3832_v11  ;;  %v1481_v22 = vmul.f32 %v1272_v39, %v1272_v39  ;;  %v4742_v39 = vld [vmem:[#allocation49_spill] sm:$0xff] }
 0x2ad   : > { %v1376_v15 = vadd.f32 %v1375_v5, %v1276_v7  ;;  %v1573_v5 = vadd.f32 %v1572_v58, %v1474_v60  ;;  %v1284_v60 = vsub.f32 %v4736_v62, %v3832_v11  ;;  %v1482_v62 = vmul.f32 %v1273_v41, %v1273_v41  ;;  %v4743_v41 = vld [vmem:[#allocation51_spill] sm:$0xff] }
 0x2af   : > { %v1377_v9 = vadd.f32 %v1376_v15, %v1277_v53  ;;  %v1574_v15 = vadd.f32 %v1573_v5, %v1475_v0  ;;  %v1285_v0 = vsub.f32 %v4737_v4, %v3832_v11  ;;  %v1483_v4 = vmul.f32 %v1274_v17, %v1274_v17  ;;  %v4744_v17 = vld [vmem:[#allocation48_spill] sm:$0xff] }
 0x2b1   : > { %v1378_v31 = vadd.f32 %v1377_v9, %v1278_v50  ;;  %v1575_v9 = vadd.f32 %v1574_v15, %v1476_v33  ;;  %v1286_v33 = vsub.f32 %v4738_v8, %v3832_v11  ;;  %v1484_v8 = vmul.f32 %v1275_v24, %v1275_v24  ;;  %v4745_v24 = vld [vmem:[#allocation50_spill] sm:$0xff] }
 0x2b3   : > { %v1379_v10 = vadd.f32 %v1378_v31, %v1279_v20  ;;  %v1576_v31 = vadd.f32 %v1575_v9, %v1477_v3  ;;  %v1287_v3 = vsub.f32 %v4739_v2, %v3832_v11  ;;  %v1485_v2 = vmul.f32 %v1276_v7, %v1276_v7  ;;  %v4746_v7 = vld [vmem:[#allocation54_spill] sm:$0xff] }
 0x2b5   : > { %v1380_v29 = vadd.f32 %v1379_v10, %v1280_v27  ;;  %v1577_v10 = vadd.f32 %v1576_v31, %v1478_v25  ;;  %v1288_v25 = vsub.f32 %v4740_v6, %v3832_v11  ;;  %v1486_v6 = vmul.f32 %v1277_v53, %v1277_v53  ;;  %v4747_v53 = vld [vmem:[#allocation56_spill] sm:$0xff] }
 0x2b7   : > { %v1381_v63 = vadd.f32 %v1380_v29, %v1281_v18  ;;  %v1578_v29 = vadd.f32 %v1577_v10, %v1479_v14  ;;  %v1289_v14 = vsub.f32 %v4741_v12, %v3832_v11  ;;  %v1487_v12 = vmul.f32 %v1278_v50, %v1278_v50  ;;  %v4748_v50 = vld [vmem:[#allocation53_spill] sm:$0xff] }
 0x2b9   : > { %v1382_v59 = vadd.f32 %v1381_v63, %v1282_v28  ;;  %v1579_v63 = vadd.f32 %v1578_v29, %v1480_v16  ;;  %v1290_v16 = vsub.f32 %v4742_v39, %v3832_v11  ;;  %v1488_v39 = vmul.f32 %v1279_v20, %v1279_v20  ;;  %v4749_v20 = vld [vmem:[#allocation55_spill] sm:$0xff] }
 0x2bb   : > { %v1383_v58 = vadd.f32 %v1382_v59, %v1283_v21  ;;  %v1580_v59 = vadd.f32 %v1579_v63, %v1481_v22  ;;  %v1291_v22 = vsub.f32 %v4743_v41, %v3832_v11  ;;  %v1489_v41 = vmul.f32 %v1280_v27, %v1280_v27  ;;  %v4750_v27 = vld [vmem:[#allocation58_spill] sm:$0xff] }
 0x2bd   : > { %v1384_v5 = vadd.f32 %v1383_v58, %v1284_v60  ;;  %v1581_v58 = vadd.f32 %v1580_v59, %v1482_v62  ;;  %v1292_v62 = vsub.f32 %v4744_v17, %v3832_v11  ;;  %v1490_v17 = vmul.f32 %v1281_v18, %v1281_v18  ;;  %v4751_v18 = vld [vmem:[#allocation61_spill] sm:$0xff] }
 0x2bf   : > { %v1385_v15 = vadd.f32 %v1384_v5, %v1285_v0  ;;  %v1582_v5 = vadd.f32 %v1581_v58, %v1483_v4  ;;  %v1293_v4 = vsub.f32 %v4745_v24, %v3832_v11  ;;  %v1491_v24 = vmul.f32 %v1282_v28, %v1282_v28  ;;  %v4752_v28 = vld [vmem:[#allocation57_spill] sm:$0xff] }
 0x2c1   : > { %v1386_v9 = vadd.f32 %v1385_v15, %v1286_v33  ;;  %v1583_v15 = vadd.f32 %v1582_v5, %v1484_v8  ;;  %v1294_v8 = vsub.f32 %v4746_v7, %v3832_v11  ;;  %v1492_v7 = vmul.f32 %v1283_v21, %v1283_v21  ;;  %v4753_v21 = vld [vmem:[#allocation59_spill] sm:$0xff] }
 0x2c3   : > { %v1387_v31 = vadd.f32 %v1386_v9, %v1287_v3  ;;  %v1584_v9 = vadd.f32 %v1583_v15, %v1485_v2  ;;  %v1295_v2 = vsub.f32 %v4747_v53, %v3832_v11  ;;  %v1493_v53 = vmul.f32 %v1284_v60, %v1284_v60  ;;  %v4754_v60 = vld [vmem:[#allocation63_spill] sm:$0xff] }
 0x2c5   : > { %v1388_v10 = vadd.f32 %v1387_v31, %v1288_v25  ;;  %v1585_v31 = vadd.f32 %v1584_v9, %v1486_v6  ;;  %v1296_v6 = vsub.f32 %v4748_v50, %v3832_v11  ;;  %v1494_v50 = vmul.f32 %v1285_v0, %v1285_v0  ;;  %v4755_v0 = vld [vmem:[#allocation65_spill] sm:$0xff] }
 0x2c7   : > { %v1389_v29 = vadd.f32 %v1388_v10, %v1289_v14  ;;  %v1586_v10 = vadd.f32 %v1585_v31, %v1487_v12  ;;  %v1297_v12 = vsub.f32 %v4749_v20, %v3832_v11  ;;  %v1495_v20 = vmul.f32 %v1286_v33, %v1286_v33  ;;  %v4756_v33 = vld [vmem:[#allocation62_spill] sm:$0xff] }
 0x2c9   : > { %v1390_v63 = vadd.f32 %v1389_v29, %v1290_v16  ;;  %v1587_v29 = vadd.f32 %v1586_v10, %v1488_v39  ;;  %v1298_v39 = vsub.f32 %v4750_v27, %v3832_v11  ;;  %v1496_v27 = vmul.f32 %v1287_v3, %v1287_v3  ;;  %v4757_v3 = vld [vmem:[#allocation64_spill] sm:$0xff] }
 0x2cb   : > { %v1391_v59 = vadd.f32 %v1390_v63, %v1291_v22  ;;  %v1588_v63 = vadd.f32 %v1587_v29, %v1489_v41  ;;  %v1299_v41 = vsub.f32 %v4751_v18, %v3832_v11  ;;  %v1497_v18 = vmul.f32 %v1288_v25, %v1288_v25  ;;  %v4758_v25 = vld [vmem:[#allocation68_spill] sm:$0xff] }
 0x2cd   : > { %v1392_v58 = vadd.f32 %v1391_v59, %v1292_v62  ;;  %v1589_v59 = vadd.f32 %v1588_v63, %v1490_v17  ;;  %v1300_v17 = vsub.f32 %v4752_v28, %v3832_v11  ;;  %v1498_v28 = vmul.f32 %v1289_v14, %v1289_v14 }
 0x2ce   : > { %v1307_v14 = vsub.f32 %v4701_v13, %v3832_v11  ;;  %v1505_v13 = vmul.f32 %v1296_v6, %v1296_v6 }
 0x2cf   : > { %v1393_v5 = vadd.f32 %v1392_v58, %v1293_v4  ;;  %v1590_v58 = vadd.f32 %v1589_v59, %v1491_v24  ;;  %v1301_v24 = vsub.f32 %v4753_v21, %v3832_v11  ;;  %v1499_v21 = vmul.f32 %v1290_v16, %v1290_v16 }
 0x2d0   : > { %v1308_v16 = vsub.f32 %v4702_v23, %v3832_v11  ;;  %v1506_v23 = vmul.f32 %v1297_v12, %v1297_v12 }
 0x2d1   : > { %v1394_v15 = vadd.f32 %v1393_v5, %v1294_v8  ;;  %v1591_v5 = vadd.f32 %v1590_v58, %v1492_v7  ;;  %v1302_v7 = vsub.f32 %v4754_v60, %v3832_v11  ;;  %v1500_v60 = vmul.f32 %v1291_v22, %v1291_v22 }
 0x2d2   : > { %v1309_v22 = vsub.f32 %v4703_v19, %v3832_v11  ;;  %v1507_v19 = vmul.f32 %v1298_v39, %v1298_v39 }
 0x2d3   : > { %v1395_v9 = vadd.f32 %v1394_v15, %v1295_v2  ;;  %v1592_v15 = vadd.f32 %v1591_v5, %v1493_v53  ;;  %v1303_v53 = vsub.f32 %v4755_v0, %v3832_v11  ;;  %v1501_v0 = vmul.f32 %v1292_v62, %v1292_v62 }
 0x2d4   : > { %v1310_v62 = vsub.f32 %v4704_v61, %v3832_v11  ;;  %v1508_v61 = vmul.f32 %v1299_v41, %v1299_v41 }
 0x2d5   : > { %v1396_v31 = vadd.f32 %v1395_v9, %v1296_v6  ;;  %v1593_v9 = vadd.f32 %v1592_v15, %v1494_v50  ;;  %v1304_v50 = vsub.f32 %v4756_v33, %v3832_v11 }
 0x2d7   : > { %v1397_v10 = vadd.f32 %v1396_v31, %v1297_v12  ;;  %v1594_v31 = vadd.f32 %v1593_v9, %v1495_v20  ;;  %v1305_v20 = vsub.f32 %v4757_v3, %v3832_v11 }
 0x2d9   : > { %v1398_v29 = vadd.f32 %v1397_v10, %v1298_v39  ;;  %v1595_v10 = vadd.f32 %v1594_v31, %v1496_v27  ;;  %v1306_v27 = vsub.f32 %v4758_v25, %v3832_v11 }
 0x2db   : > { %v1399_v63 = vadd.f32 %v1398_v29, %v1299_v41  ;;  %v1596_v29 = vadd.f32 %v1595_v10, %v1497_v18  ;;  %v1502_v10 = vmul.f32 %v1293_v4, %v1293_v4  ;;  %v1311_v4 = vsub.f32 %v4705_v1, %v3832_v11  ;;  %v1314_v41 = vld [vmem:[#allocation3] sm:$0x1] }
 0x2dc   : > { %v1510_v1 = vmul.f32 %v1301_v24, %v1301_v24 }
 0x2dd   : > { %v1400_v59 = vadd.f32 %v1399_v63, %v1300_v17  ;;  %v1597_v63 = vadd.f32 %v1596_v29, %v1498_v28  ;;  %v1503_v29 = vmul.f32 %v1294_v8, %v1294_v8  ;;  %v4759_v8 = vld [vmem:[#allocation73_spill] sm:$0xff] }
 0x2de   : > { %v1312_v25 = vsub.f32 %v4759_v8, %v3832_v11 }
 0x2df   : > { %v1401_v58 = vadd.f32 %v1400_v59, %v1301_v24  ;;  %v1598_v59 = vadd.f32 %v1597_v63, %v1499_v21  ;;  %v1504_v21 = vmul.f32 %v1295_v2, %v1295_v2  ;;  %v4760_v2 = vld [vmem:[#allocation77_spill] sm:$0xff] }
 0x2e1   : > { %v1402_v5 = vadd.f32 %v1401_v58, %v1302_v7  ;;  %v1599_v58 = vadd.f32 %v1598_v59, %v1500_v60 }
 0x2e3   : > { %v1403_v15 = vadd.f32 %v1402_v5, %v1303_v53  ;;  %v1600_v5 = vadd.f32 %v1599_v58, %v1501_v0  ;;  %v1313_v58 = vsub.f32 %v4760_v2, %v3832_v11  ;;  %v1514_v11 = vmul.f32 %v1305_v20, %v1305_v20 }
 0x2e4   : > { %v1517_v2 = vmul.f32 %v1308_v16, %v1308_v16 }
 0x2e5   : > { %v1404_v9 = vadd.f32 %v1403_v15, %v1304_v50  ;;  %v1601_v33 = vadd.f32 %v1600_v5, %v1502_v10  ;;  %v1509_v5 = vmul.f32 %v1300_v17, %v1300_v17 }
 0x2e7   : > { %v1405_v31 = vadd.f32 %v1404_v9, %v1305_v20  ;;  %v1602_v63 = vadd.f32 %v1601_v33, %v1503_v29  ;;  %v1522_v20 = vmul.f32 %v1313_v58, %v1313_v58 }
 0x2e9   : > { %v1406_v18 = vadd.f32 %v1405_v31, %v1306_v27  ;;  %v1603_v9 = vadd.f32 %v1602_v63, %v1504_v21 }
 0x2eb   : > { %v1407_v28 = vadd.f32 %v1406_v18, %v1307_v14  ;;  %v1604_v59 = vadd.f32 %v1603_v9, %v1505_v13  ;;  %v1513_v9 = vmul.f32 %v1304_v50, %v1304_v50 }
 0x2ed   : > { %v1408_v15 = vadd.f32 %v1407_v28, %v1308_v16  ;;  %v1605_v0 = vadd.f32 %v1604_v59, %v1506_v23 }
 0x2ef   : > { %v1409_v3 = vadd.f32 %v1408_v15, %v1309_v22  ;;  %v1606_v10 = vadd.f32 %v1605_v0, %v1507_v19  ;;  %v1511_v15 = vmul.f32 %v1302_v7, %v1302_v7  ;;  %v1516_v0 = vmul.f32 %v1307_v14, %v1307_v14 }
 0x2f1   : > { %v1410_v60 = vadd.f32 %v1409_v3, %v1310_v62  ;;  %v1607_v28 = vadd.f32 %v1606_v10, %v1508_v61  ;;  %v1512_v3 = vmul.f32 %v1303_v53, %v1303_v53  ;;  %v1519_v53 = vmul.f32 %v1310_v62, %v1310_v62 }
 0x2f3   : > { %v1411_v31 = vadd.f32 %v1410_v60, %v1311_v4  ;;  %v1608_v33 = vadd.f32 %v1607_v28, %v1509_v5  ;;  %v1521_v5 = vmul.f32 %v1312_v25, %v1312_v25 }
 0x2f5   : > { %v1412_v18 = vadd.f32 %v1411_v31, %v1312_v25  ;;  %v1609_v21 = vadd.f32 %v1608_v33, %v1510_v1  ;;  %v1515_v31 = vmul.f32 %v1306_v27, %v1306_v27 }
 0x2f7   : > { %v1413_v6 = vadd.f32 %v1412_v18, %v1313_v58  ;;  %v1610_v13 = vadd.f32 %v1609_v21, %v1511_v15  ;;  %v1518_v18 = vmul.f32 %v1309_v22, %v1309_v22  ;;  %v1422_v21 = vld [vmem:[#allocation4] sm:$0x1] }
 0x2f9   : > { %v1414_v29 = vrot.slane %v1413_v6, 4  ;;  %v1611_v60 = vadd.f32 %v1610_v13, %v1512_v3 }
 0x2fb   : > { %v1415_v12 = vadd.f32 %v1414_v29, %v1413_v6  ;;  %v1612_v59 = vadd.f32 %v1611_v60, %v1513_v9  ;;  %v1520_v6 = vmul.f32 %v1311_v4, %v1311_v4 }
 0x2fd   : > { %v1416_v63 = vrot.slane %v1415_v12, 2  ;;  %v1613_v17 = vadd.f32 %v1612_v59, %v1514_v11 }
 0x2ff   : > { %v1417_v39 = vadd.f32 %v1416_v63, %v1415_v12  ;;  %v1614_v24 = vadd.f32 %v1613_v17, %v1515_v31 }
 0x301   : > { %v1418_v23 = vrot.slane %v1417_v39, 1  ;;  %v1615_v7 = vadd.f32 %v1614_v24, %v1516_v0 }
 0x303   : > { %v1419_v8 = vadd.f32 %v1418_v23, %v1417_v39  ;;  %v1616_v61 = vadd.f32 %v1615_v7, %v1517_v2 }
 0x305   : > { %v1420_v19 = vadd.f32 %v1419_v8, %v1314_v41  ;;  %v1617_v10 = vadd.f32 %v1616_v61, %v1518_v18 }
 0x307   : > { %1421 = vst [vmem:[#allocation3] sm:$0x1] %v1420_v19  ;;  %v1618_v50 = vadd.f32 %v1617_v10, %v1519_v53 }
 0x309   : > { %v1619_v28 = vadd.f32 %v1618_v50, %v1520_v6 }
 0x30b   : > { %v1620_v29 = vadd.f32 %v1619_v28, %v1521_v5 }
 0x30d   : > { %v1621_v1 = vadd.f32 %v1620_v29, %v1522_v20 }
 0x30f   : > { %v1622_v33 = vrot.slane %v1621_v1, 4 }
 0x311   : > { %v1623_v27 = vadd.f32 %v1622_v33, %v1621_v1 }
 0x313   : > { %v1624_v12 = vrot.slane %v1623_v27, 2 }
 0x315   : > { %v1625_v15 = vadd.f32 %v1624_v12, %v1623_v27 }
 0x317   : > { %v1626_v14 = vrot.slane %v1625_v15, 1 }
 0x319   : > { %v1627_v63 = vadd.f32 %v1626_v14, %v1625_v15 }
 0x31b   : > { %v1628_v16 = vadd.f32 %v1627_v63, %v1422_v21 }
 0x31d   : > { %1629 = vst [vmem:[#allocation4] sm:$0x1] %v1628_v16 }
 0x31e PF: > { %p2511_p5 = scmp.ne.s32.totalorder %s3306_s12, 1 }
 0x320   : > { %1633 = sbr.rel (%p2511_p5) target bundleno = 912 (0x390), region = 44 }
 0x325   : > { %v1638_v22 = vld [vmem:[#allocation2] sm:$0x1]  ;;  %v1639_v62 = vld [vmem:[#allocation3] sm:$0x1]  ;;  %v1642_v58 = vld [vmem:[#allocation4] sm:$0x1] }
 0x326   : > { %v1640_v4 = vmul.f32 0.0, %v1638_v22  ;;  %v1643_v25 = vmul.f32 %v1638_v22, %v1638_v22  ;;  %v1651_v8 = vld [vmem:[%s4506_s2] sm:$0x1]  ;;  %v1652_v0 = vld [vmem:[%s4506_s2 + $0x1] sm:$0x1]  ;;  %v4761_v18 = vld [vmem:[#allocation9_spill] sm:$0xff] }
 0x327   : > { %v4762_v53 = vld [vmem:[#allocation13_spill] sm:$0xff]  ;;  %v4763_v6 = vld [vmem:[#allocation7_spill] sm:$0xff] }
 0x328   : > { %v1641_v3 = vadd.f32 %v1640_v4, %v1639_v62  ;;  %v1644_v13 = vmul.f32 0.0, %v1643_v25  ;;  %v4764_v5 = vld [vmem:[#allocation11_spill] sm:$0xff]  ;;  %v4765_v20 = vld [vmem:[#allocation17_spill] sm:$0xff] }
 0x329   : > { %v4766_v1 = vld [vmem:[#allocation21_spill] sm:$0xff]  ;;  %v4767_v27 = vld [vmem:[#allocation15_spill] sm:$0xff] }
 0x32a   : > { %v1645_v39 = vsub.f32 %v1642_v58, %v1644_v13  ;;  %v1646_v9 = vmul.f32 0.00125, %v1641_v3  ;;  %v4768_v15 = vld [vmem:[#allocation19_spill] sm:$0xff]  ;;  %v4769_v21 = vld [vmem:[#allocation25_spill] sm:$0xff] }
 0x32b   : > { %v4770_v16 = vld [vmem:[#allocation29_spill] sm:$0xff]  ;;  %v4771_v62 = vld [vmem:[#allocation23_spill] sm:$0xff] }
 0x32c   : > { %v1647_v60 = vmul.f32 0.00125, %v1645_v39  ;;  %v1648_v23 = vmul.f32 %v1646_v9, %v1646_v9  ;;  %v1657_v31 = vadd.f32 %v1646_v9, %v1638_v22  ;;  %v4772_v25 = vld [vmem:[#allocation27_spill] sm:$0xff]  ;;  %v4773_v13 = vld [vmem:[#allocation33_spill] sm:$0xff] }
 0x32d   : > { %v4774_v9 = vld [vmem:[#allocation37_spill] sm:$0xff] }
 0x32e   : > { %v1649_v11 = vsub.f32 %v1647_v60, %v1648_v23  ;;  %v4775_v23 = vld [vmem:[#allocation31_spill] sm:$0xff] }
 0x330   : > { %v1650_v59 = vmax.f32 %v1649_v11, 0.0 }
 0x332   : > { %v1653_v41 = vadd.f32 1e-05, %v1650_v59  ;;  %v4776_v59 = vld [vmem:[#allocation35_spill] sm:$0xff] }
 0x334   : > { %3290 = vrsqrt.f32 %v1653_v41 }
 0x341   : > { %v3291_v17 = vpop.eup %3290 }
 0x342   : > { %v1655_v19 = vmul.f32 %v3291_v17, %v1651_v8 }
 0x344   : > { %1656 = vst [vmem:[#allocation5] sm:$0x1] %v1655_v19  ;;  %v1658_v24 = vmul.f32 %v1657_v31, %v1655_v19 }
 0x346   : > { %v1659_v2 = vsub.f32 %v1652_v0, %v1658_v24 }
 0x348   : > { %1660 = vst [vmem:[#allocation6] sm:$0x1] %v1659_v2 }
 0x34b   : > { %v4041_v7 = vld [vmem:[#allocation5] ss:$0 sm:$0xff] }
 0x34c   : > { %v1668_v61 = vmul.f32 %v4041_v7, %v4761_v18  ;;  %v1669_v10 = vmul.f32 %v4041_v7, %v4762_v53  ;;  %v1670_v50 = vmul.f32 %v4763_v6, %v4041_v7  ;;  %v1671_v28 = vmul.f32 %v4764_v5, %v4041_v7 }
 0x34d   : > { %v1672_v29 = vmul.f32 %v4041_v7, %v4765_v20  ;;  %v1673_v33 = vmul.f32 %v4041_v7, %v4766_v1  ;;  %v1674_v12 = vmul.f32 %v4767_v27, %v4041_v7  ;;  %v1675_v14 = vmul.f32 %v4768_v15, %v4041_v7 }
 0x34e   : > { %v1676_v63 = vmul.f32 %v4041_v7, %v4769_v21  ;;  %v1677_v22 = vmul.f32 %v4041_v7, %v4770_v16  ;;  %v1678_v4 = vmul.f32 %v4771_v62, %v4041_v7  ;;  %v1679_v58 = vmul.f32 %v4772_v25, %v4041_v7 }
 0x34f   : > { %v4067_v3 = vld [vmem:[#allocation6] ss:$0 sm:$0xff]  ;;  %v1680_v39 = vmul.f32 %v4041_v7, %v4773_v13  ;;  %v1681_v60 = vmul.f32 %v4041_v7, %v4774_v9  ;;  %v1682_v11 = vmul.f32 %v4775_v23, %v4041_v7  ;;  %v1683_v41 = vmul.f32 %v4776_v59, %v4041_v7 }
 0x350   : > { %v1775_v8 = vadd.f32 %v4067_v3, %v1668_v61  ;;  %v1776_v31 = vadd.f32 %v4067_v3, %v1669_v10  ;;  %v1777_v17 = vadd.f32 %v4067_v3, %v1670_v50  ;;  %v1778_v19 = vadd.f32 %v4067_v3, %v1671_v28 }
 0x351   : > { %v1779_v0 = vadd.f32 %v4067_v3, %v1672_v29  ;;  %v1780_v24 = vadd.f32 %v4067_v3, %v1673_v33  ;;  %v1781_v2 = vadd.f32 %v4067_v3, %v1674_v12  ;;  %v1782_v18 = vadd.f32 %v4067_v3, %v1675_v14  ;;  %v4777_v14 = vld [vmem:[#allocation40_spill] sm:$0xff] }
 0x352   : > { %v2721_v53 = vpack.c.bf16 %v1776_v31, %v1775_v8  ;;  %v2726_v6 = vpack.c.bf16 %v1778_v19, %v1777_v17  ;;  %v1783_v5 = vadd.f32 %v4067_v3, %v1676_v63  ;;  %v1784_v61 = vadd.f32 %v4067_v3, %v1677_v22 }
 0x353   : > { %v2731_v20 = vpack.c.bf16 %v1780_v24, %v1779_v0  ;;  %v2736_v10 = vpack.c.bf16 %v1782_v18, %v1781_v2  ;;  %v1785_v50 = vadd.f32 %v4067_v3, %v1678_v4  ;;  %v1786_v28 = vadd.f32 %v4067_v3, %v1679_v58  ;;  %v4778_v24 = vld [vmem:[#allocation52_spill] sm:$0xff] }
 0x354   : > { %2722 = vst [vmem:[%s4507_s3] sm:$0xff] %v2721_v53   ;;  %2968 = vst [vmem:[%s4507_s3 + $0x8] sm:$0xff] %v2726_v6   ;;  %v2741_v29 = vpack.c.bf16 %v1784_v61, %v1783_v5  ;;  %v1787_v1 = vadd.f32 %v4067_v3, %v1680_v39  ;;  %v1788_v33 = vadd.f32 %v4067_v3, %v1681_v60 }
 0x355   : > { %v1789_v27 = vadd.f32 %v4067_v3, %v1682_v11  ;;  %2969 = vst [vmem:[%s4507_s3 + $0x10] sm:$0xff] %v2731_v20   ;;  %2970 = vst [vmem:[%s4507_s3 + $0x18] sm:$0xff] %v2736_v10   ;;  %v2746_v12 = vpack.c.bf16 %v1786_v28, %v1785_v50  ;;  %v1790_v15 = vadd.f32 %v4067_v3, %v1683_v41  ;;  %v4779_v10 = vld [vmem:[#allocation60_spill] sm:$0xff] }
 0x356   : > { %v1684_v21 = vmul.f32 %v4041_v7, %v4777_v14  ;;  %v1685_v63 = vmul.f32 %v4041_v7, %v3607_v32  ;;  %2971 = vst [vmem:[%s4507_s3 + $0x20] sm:$0xff] %v2741_v29   ;;  %v2751_v16 = vpack.c.bf16 %v1788_v33, %v1787_v1  ;;  %v1686_v22 = vmul.f32 %v3595_v26, %v4041_v7 }
 0x357   : > { %v1687_v62 = vmul.f32 %v3603_v30, %v4041_v7  ;;  %v1688_v4 = vmul.f32 %v4041_v7, %v3615_v36  ;;  %2972 = vst [vmem:[%s4507_s3 + $0x28] sm:$0xff] %v2746_v12   ;;  %v2756_v25 = vpack.c.bf16 %v1790_v15, %v1789_v27  ;;  %v1689_v13 = vmul.f32 %v4041_v7, %v3623_v40 }
 0x358   : > { %v1791_v32 = vadd.f32 %v4067_v3, %v1684_v21  ;;  %v1792_v58 = vadd.f32 %v4067_v3, %v1685_v63  ;;  %2973 = vst [vmem:[%s4507_s3 + $0x30] sm:$0xff] %v2751_v16   ;;  %v1793_v26 = vadd.f32 %v4067_v3, %v1686_v22  ;;  %v1690_v39 = vmul.f32 %v3611_v34, %v4041_v7 }
 0x359   : > { %v1794_v30 = vadd.f32 %v4067_v3, %v1687_v62  ;;  %v1795_v36 = vadd.f32 %v4067_v3, %v1688_v4  ;;  %2974 = vst [vmem:[%s4507_s3 + $0x38] sm:$0xff] %v2756_v25   ;;  %v1796_v40 = vadd.f32 %v4067_v3, %v1689_v13  ;;  %v1691_v60 = vmul.f32 %v3619_v38, %v4041_v7  ;;  %v4780_v25 = vld [vmem:[#allocation66_spill] sm:$0xff] }
 0x35a   : > { %v2761_v9 = vpack.c.bf16 %v1792_v58, %v1791_v32  ;;  %v1692_v23 = vmul.f32 %v4041_v7, %v3631_v44  ;;  %v1797_v59 = vadd.f32 %v4067_v3, %v1690_v39  ;;  %v1693_v41 = vmul.f32 %v4041_v7, %v3639_v48 }
 0x35b   : > { %v2766_v11 = vpack.c.bf16 %v1794_v30, %v1793_v26  ;;  %v1694_v34 = vmul.f32 %v3627_v42, %v4041_v7  ;;  %v2771_v8 = vpack.c.bf16 %v1796_v40, %v1795_v36  ;;  %v1798_v31 = vadd.f32 %v4067_v3, %v1691_v60  ;;  %v4782_v26 = vld [vmem:[#allocation74_spill] sm:$0xff]  ;;  %v4784_v60 = vld [vmem:[#allocation72_spill] sm:$0xff] }
 0x35c   : > { %2975 = vst [vmem:[%s4507_s3 + $0x40] sm:$0xff] %v2761_v9   ;;  %v1799_v38 = vadd.f32 %v4067_v3, %v1692_v23  ;;  %v1695_v44 = vmul.f32 %v3635_v46, %v4041_v7  ;;  %v1800_v48 = vadd.f32 %v4067_v3, %v1693_v41  ;;  %v1696_v17 = vmul.f32 %v4041_v7, %v3647_v52  ;;  %v4783_v36 = vld [vmem:[#allocation78_spill] sm:$0xff] }
 0x35d   : > { %2976 = vst [vmem:[%s4507_s3 + $0x48] sm:$0xff] %v2766_v11   ;;  %v1801_v42 = vadd.f32 %v4067_v3, %v1694_v34  ;;  %v1697_v19 = vmul.f32 %v4041_v7, %v3655_v56  ;;  %2977 = vst [vmem:[%s4507_s3 + $0x50] sm:$0xff] %v2771_v8   ;;  %v2776_v0 = vpack.c.bf16 %v1798_v31, %v1797_v59  ;;  %v4785_v11 = vld [vmem:[#allocation76_spill] sm:$0xff]  ;;  %v4786_v31 = vld [vmem:[#allocation81_spill] sm:$0xff] }
 0x35e   : > { %v1802_v46 = vadd.f32 %v4067_v3, %v1695_v44  ;;  %v1698_v2 = vmul.f32 %v4778_v24, %v4041_v7  ;;  %v1699_v18 = vmul.f32 %v3651_v54, %v4041_v7  ;;  %v2781_v53 = vpack.c.bf16 %v1800_v48, %v1799_v38  ;;  %v4788_v24 = vld [vmem:[#allocation80_spill] sm:$0xff] }
 0x35f   : > { %v1803_v6 = vadd.f32 %v4067_v3, %v1696_v17  ;;  %v1804_v52 = vadd.f32 %v4067_v3, %v1697_v19  ;;  %v1700_v56 = vmul.f32 %v4041_v7, %v3663_v49  ;;  %2978 = vst [vmem:[%s4507_s3 + $0x58] sm:$0xff] %v2776_v0   ;;  %v1701_v54 = vmul.f32 %v4041_v7, %v4779_v10  ;;  %v4787_v17 = vld [vmem:[#allocation83_spill] sm:$0xff] }
 0x360   : > { %v2786_v5 = vpack.c.bf16 %v1802_v46, %v1801_v42  ;;  %v1805_v61 = vadd.f32 %v4067_v3, %v1698_v2  ;;  %v1806_v20 = vadd.f32 %v4067_v3, %v1699_v18  ;;  %2979 = vst [vmem:[%s4507_s3 + $0x60] sm:$0xff] %v2781_v53   ;;  %v1702_v49 = vmul.f32 %v3659_v47, %v4041_v7  ;;  %v4789_v18 = vld [vmem:[#allocation82_spill] sm:$0xff] }
 0x361   : > { %v2791_v50 = vpack.c.bf16 %v1804_v52, %v1803_v6  ;;  %v1807_v28 = vadd.f32 %v4067_v3, %v1700_v56  ;;  %v1703_v29 = vmul.f32 %v3667_v51, %v4041_v7  ;;  %v1808_v33 = vadd.f32 %v4067_v3, %v1701_v54  ;;  %v4790_v56 = vld [vmem:[#allocation10_spill] sm:$0xff] }
 0x362   : > { %2980 = vst [vmem:[%s4507_s3 + $0x68] sm:$0xff] %v2786_v5   ;;  %v2796_v1 = vpack.c.bf16 %v1806_v20, %v1805_v61  ;;  %v1704_v27 = vmul.f32 %v4041_v7, %v3679_v57  ;;  %v1705_v12 = vmul.f32 %v4041_v7, %v3687_v45  ;;  %v1809_v47 = vadd.f32 %v4067_v3, %v1702_v49  ;;  %v4791_v61 = vld [vmem:[#allocation14_spill] sm:$0xff]  ;;  %v4793_v49 = vld [vmem:[#allocation12_spill] sm:$0xff] }
 0x363   : > { %2981 = vst [vmem:[%s4507_s3 + $0x70] sm:$0xff] %v2791_v50   ;;  %v1810_v51 = vadd.f32 %v4067_v3, %v1703_v29  ;;  %v1706_v15 = vmul.f32 %v3675_v55, %v4041_v7  ;;  %v1707_v14 = vmul.f32 %v3683_v43, %v4041_v7  ;;  %v2801_v57 = vpack.c.bf16 %v1808_v33, %v1807_v28  ;;  %v4792_v50 = vld [vmem:[#allocation8_spill] sm:$0xff] }
 0x364   : > { %2982 = vst [vmem:[%s4507_s3 + $0x78] sm:$0xff] %v2796_v1   ;;  %v1811_v45 = vadd.f32 %v4067_v3, %v1704_v27  ;;  %v1812_v21 = vadd.f32 %v4067_v3, %v1705_v12  ;;  %v1708_v63 = vmul.f32 %v4041_v7, %v3695_v35  ;;  %v1709_v43 = vmul.f32 %v4041_v7, %v3703_v37  ;;  %v4781_v35 = vld [vmem:[#allocation69_spill] sm:$0xff]  ;;  %v4794_v12 = vld [vmem:[#allocation18_spill] sm:$0xff] }
 0x365   : > { %v2806_v16 = vpack.c.bf16 %v1810_v51, %v1809_v47  ;;  %v1813_v22 = vadd.f32 %v4067_v3, %v1706_v15  ;;  %v1814_v55 = vadd.f32 %v4067_v3, %v1707_v14  ;;  %2983 = vst [vmem:[%s4507_s3 + $0x80] sm:$0xff] %v2801_v57   ;;  %v1710_v32 = vmul.f32 %v4780_v25, %v4041_v7  ;;  %v4795_v57 = vld [vmem:[#allocation22_spill] sm:$0xff] }
 0x366   : > { %v2811_v62 = vpack.c.bf16 %v1812_v21, %v1811_v45  ;;  %v1815_v4 = vadd.f32 %v4067_v3, %v1708_v63  ;;  %v1711_v58 = vmul.f32 %v4781_v35, %v4041_v7  ;;  %v1816_v37 = vadd.f32 %v4067_v3, %v1709_v43  ;;  %v4798_v25 = vld [vmem:[#allocation26_spill] sm:$0xff] }
 0x367   : > { %2984 = vst [vmem:[%s4507_s3 + $0x88] sm:$0xff] %v2806_v16   ;;  %v2816_v13 = vpack.c.bf16 %v1814_v55, %v1813_v22  ;;  %v1712_v30 = vmul.f32 %v4041_v7, %v4782_v26  ;;  %v1713_v39 = vmul.f32 %v4041_v7, %v4783_v36  ;;  %v1817_v9 = vadd.f32 %v4067_v3, %v1710_v32  ;;  %v4796_v16 = vld [vmem:[#allocation16_spill] sm:$0xff]  ;;  %v4799_v35 = vld [vmem:[#allocation30_spill] sm:$0xff] }
 0x368   : > { %2985 = vst [vmem:[%s4507_s3 + $0x90] sm:$0xff] %v2811_v62   ;;  %v1818_v40 = vadd.f32 %v4067_v3, %v1711_v58  ;;  %v1714_v23 = vmul.f32 %v4784_v60, %v4041_v7  ;;  %v1715_v59 = vmul.f32 %v4785_v11, %v4041_v7  ;;  %v2821_v41 = vpack.c.bf16 %v1816_v37, %v1815_v4  ;;  %v4797_v55 = vld [vmem:[#allocation20_spill] sm:$0xff] }
 0x369   : > { %2986 = vst [vmem:[%s4507_s3 + $0x98] sm:$0xff] %v2816_v13   ;;  %v1819_v34 = vadd.f32 %v4067_v3, %v1712_v30  ;;  %v1820_v8 = vadd.f32 %v4067_v3, %v1713_v39  ;;  %v1716_v38 = vmul.f32 %v4041_v7, %v4786_v31  ;;  %v1717_v19 = vmul.f32 %v4041_v7, %v4787_v17  ;;  %v4800_v26 = vld [vmem:[#allocation24_spill] sm:$0xff] }
 0x36a   : > { %v2826_v44 = vpack.c.bf16 %v1818_v40, %v1817_v9  ;;  %v1821_v48 = vadd.f32 %v4067_v3, %v1714_v23  ;;  %v1822_v42 = vadd.f32 %v4067_v3, %v1715_v59  ;;  %2987 = vst [vmem:[%s4507_s3 + $0xa0] sm:$0xff] %v2821_v41   ;;  %v1718_v2 = vmul.f32 %v4788_v24, %v4041_v7  ;;  %v4801_v36 = vld [vmem:[#allocation28_spill] sm:$0xff]  ;;  %v4802_v23 = vld [vmem:[#allocation34_spill] sm:$0xff]  ;;  %v4806_v24 = vld [vmem:[#allocation41_spill] sm:$0xff] }
 0x36b   : > { %v2831_v0 = vpack.c.bf16 %v1820_v8, %v1819_v34  ;;  %v1823_v46 = vadd.f32 %v4067_v3, %v1716_v38  ;;  %v1719_v53 = vmul.f32 %v4789_v18, %v4041_v7  ;;  %v1824_v52 = vadd.f32 %v4067_v3, %v1717_v19  ;;  %v4803_v8 = vld [vmem:[#allocation38_spill] sm:$0xff]  ;;  %v4805_v17 = vld [vmem:[#allocation36_spill] sm:$0xff]  ;;  %v4807_v18 = vld [vmem:[#allocation43_spill] sm:$0xff] }
 0x36c   : > { %2988 = vst [vmem:[%s4507_s3 + $0xa8] sm:$0xff] %v2826_v44   ;;  %v2836_v6 = vpack.c.bf16 %v1822_v42, %v1821_v48  ;;  %v1720_v5 = vmul.f32 %v4041_v7, %v4790_v56  ;;  %v1721_v20 = vmul.f32 %v4041_v7, %v4791_v61  ;;  %v1825_v10 = vadd.f32 %v4067_v3, %v1718_v2  ;;  %v4804_v48 = vld [vmem:[#allocation32_spill] sm:$0xff]  ;;  %v4808_v56 = vld [vmem:[#allocation39_spill] sm:$0xff]  ;;  %v4809_v61 = vld [vmem:[#allocation42_spill] sm:$0xff] }
 0x36d   : > { %2989 = vst [vmem:[%s4507_s3 + $0xb0] sm:$0xff] %v2831_v0   ;;  %v1826_v54 = vadd.f32 %v4067_v3, %v1719_v53  ;;  %v1722_v28 = vmul.f32 %v4792_v50, %v4041_v7  ;;  %v1723_v29 = vmul.f32 %v4793_v49, %v4041_v7  ;;  %v2841_v1 = vpack.c.bf16 %v1824_v52, %v1823_v46 }
 0x36e   : > { %2990 = vst [vmem:[%s4507_s3 + $0xb8] sm:$0xff] %v2836_v6   ;;  %v1827_v33 = vadd.f32 %v4067_v3, %v1720_v5  ;;  %v1828_v27 = vadd.f32 %v4067_v3, %v1721_v20  ;;  %v1724_v47 = vmul.f32 %v4041_v7, %v4794_v12  ;;  %v1725_v45 = vmul.f32 %v4041_v7, %v4795_v57  ;;  %v4813_v57 = vld [vmem:[#allocation46_spill] sm:$0xff] }
 0x36f   : > { %v2846_v51 = vpack.c.bf16 %v1826_v54, %v1825_v10  ;;  %v1829_v15 = vadd.f32 %v4067_v3, %v1722_v28  ;;  %v1830_v14 = vadd.f32 %v4067_v3, %v1723_v29  ;;  %2991 = vst [vmem:[%s4507_s3 + $0xc0] sm:$0xff] %v2841_v1   ;;  %v1726_v22 = vmul.f32 %v4796_v16, %v4041_v7  ;;  %v4810_v28 = vld [vmem:[#allocation45_spill] sm:$0xff] }
 0x370   : > { %v2851_v21 = vpack.c.bf16 %v1828_v27, %v1827_v33  ;;  %v1831_v63 = vadd.f32 %v4067_v3, %v1724_v47  ;;  %v1727_v43 = vmul.f32 %v4797_v55, %v4041_v7  ;;  %v1832_v4 = vadd.f32 %v4067_v3, %v1725_v45  ;;  %v4811_v27 = vld [vmem:[#allocation47_spill] sm:$0xff]  ;;  %v4814_v16 = vld [vmem:[#allocation49_spill] sm:$0xff] }
 0x371   : > { %2992 = vst [vmem:[%s4507_s3 + $0xc8] sm:$0xff] %v2846_v51   ;;  %v2856_v62 = vpack.c.bf16 %v1830_v14, %v1829_v15  ;;  %v1728_v32 = vmul.f32 %v4041_v7, %v4798_v25  ;;  %v1729_v58 = vmul.f32 %v4041_v7, %v4799_v35  ;;  %v1833_v13 = vadd.f32 %v4067_v3, %v1726_v22  ;;  %v4812_v15 = vld [vmem:[#allocation44_spill] sm:$0xff]  ;;  %v4815_v55 = vld [vmem:[#allocation51_spill] sm:$0xff]  ;;  %v4817_v35 = vld [vmem:[#allocation50_spill] sm:$0xff] }
 0x372   : > { %2993 = vst [vmem:[%s4507_s3 + $0xd0] sm:$0xff] %v2851_v21   ;;  %v1834_v37 = vadd.f32 %v4067_v3, %v1727_v43  ;;  %v1730_v30 = vmul.f32 %v4800_v26, %v4041_v7  ;;  %v1731_v39 = vmul.f32 %v4801_v36, %v4041_v7  ;;  %v2861_v9 = vpack.c.bf16 %v1832_v4, %v1831_v63  ;;  %v4816_v25 = vld [vmem:[#allocation48_spill] sm:$0xff] }
 0x373   : > { %2994 = vst [vmem:[%s4507_s3 + $0xd8] sm:$0xff] %v2856_v62   ;;  %v1835_v40 = vadd.f32 %v4067_v3, %v1728_v32  ;;  %v1836_v60 = vadd.f32 %v4067_v3, %v1729_v58  ;;  %v1732_v11 = vmul.f32 %v4041_v7, %v4802_v23  ;;  %v1733_v31 = vmul.f32 %v4041_v7, %v4803_v8  ;;  %v4821_v8 = vld [vmem:[#allocation55_spill] sm:$0xff] }
 0x374   : > { %v2866_v59 = vpack.c.bf16 %v1834_v37, %v1833_v13  ;;  %v1837_v41 = vadd.f32 %v4067_v3, %v1730_v30  ;;  %v1838_v34 = vadd.f32 %v4067_v3, %v1731_v39  ;;  %2995 = vst [vmem:[%s4507_s3 + $0xe0] sm:$0xff] %v2861_v9   ;;  %v1734_v42 = vmul.f32 %v4804_v48, %v4041_v7  ;;  %v4818_v30 = vld [vmem:[#allocation54_spill] sm:$0xff] }
 0x375   : > { %v2871_v38 = vpack.c.bf16 %v1836_v60, %v1835_v40  ;;  %v1839_v44 = vadd.f32 %v4067_v3, %v1732_v11  ;;  %v1735_v19 = vmul.f32 %v4805_v17, %v4041_v7  ;;  %v1840_v46 = vadd.f32 %v4067_v3, %v1733_v31  ;;  %v4819_v60 = vld [vmem:[#allocation56_spill] sm:$0xff]  ;;  %v4822_v48 = vld [vmem:[#allocation58_spill] sm:$0xff]  ;;  %v4823_v17 = vld [vmem:[#allocation61_spill] sm:$0xff] }
 0x376   : > { %2996 = vst [vmem:[%s4507_s3 + $0xe8] sm:$0xff] %v2866_v59   ;;  %v2876_v0 = vpack.c.bf16 %v1838_v34, %v1837_v41  ;;  %v1736_v2 = vmul.f32 %v4041_v7, %v4806_v24  ;;  %v1737_v53 = vmul.f32 %v4041_v7, %v4807_v18  ;;  %v1841_v6 = vadd.f32 %v4067_v3, %v1734_v42  ;;  %v4820_v41 = vld [vmem:[#allocation53_spill] sm:$0xff]  ;;  %v4825_v18 = vld [vmem:[#allocation59_spill] sm:$0xff] }
 0x377   : > { %2997 = vst [vmem:[%s4507_s3 + $0xf0] sm:$0xff] %v2871_v38   ;;  %v1842_v52 = vadd.f32 %v4067_v3, %v1735_v19  ;;  %v1738_v5 = vmul.f32 %v4808_v56, %v4041_v7  ;;  %v1739_v20 = vmul.f32 %v4809_v61, %v4041_v7  ;;  %v2881_v10 = vpack.c.bf16 %v1840_v46, %v1839_v44  ;;  %v4824_v24 = vld [vmem:[#allocation57_spill] sm:$0xff] }
 0x378   : > { %2998 = vst [vmem:[%s4507_s3 + $0xf8] sm:$0xff] %v2876_v0   ;;  %v1843_v54 = vadd.f32 %v4067_v3, %v1736_v2  ;;  %v1844_v50 = vadd.f32 %v4067_v3, %v1737_v53  ;;  %v1740_v49 = vmul.f32 %v4041_v7, %v4810_v28  ;;  %v1741_v12 = vmul.f32 %v4041_v7, %v4811_v27  ;;  %v4829_v27 = vld [vmem:[#allocation64_spill] sm:$0xff] }
 0x379   : > { %v2886_v29 = vpack.c.bf16 %v1842_v52, %v1841_v6  ;;  %v1845_v1 = vadd.f32 %v4067_v3, %v1738_v5  ;;  %v1846_v33 = vadd.f32 %v4067_v3, %v1739_v20  ;;  %2999 = vst [vmem:[%s4507_s3 + $0x100] sm:$0xff] %v2881_v10   ;;  %v1742_v14 = vmul.f32 %v4812_v15, %v4041_v7  ;;  %v4826_v5 = vld [vmem:[#allocation63_spill] sm:$0xff]  ;;  %v4830_v15 = vld [vmem:[#allocation68_spill] sm:$0xff] }
 0x37a   : > { %v2891_v47 = vpack.c.bf16 %v1844_v50, %v1843_v54  ;;  %v1847_v51 = vadd.f32 %v4067_v3, %v1740_v49  ;;  %v1743_v45 = vmul.f32 %v4813_v57, %v4041_v7  ;;  %v1848_v63 = vadd.f32 %v4067_v3, %v1741_v12  ;;  %v4827_v50 = vld [vmem:[#allocation65_spill] sm:$0xff]  ;;  %v4831_v57 = vld [vmem:[#allocation71_spill] sm:$0xff] }
 0x37b   : > { %3000 = vst [vmem:[%s4507_s3 + $0x108] sm:$0xff] %v2886_v29   ;;  %v2896_v21 = vpack.c.bf16 %v1846_v33, %v1845_v1  ;;  %v1744_v22 = vmul.f32 %v4041_v7, %v4814_v16  ;;  %v1745_v43 = vmul.f32 %v4041_v7, %v4815_v55  ;;  %v1849_v62 = vadd.f32 %v4067_v3, %v1742_v14  ;;  %v4828_v1 = vld [vmem:[#allocation62_spill] sm:$0xff]  ;;  %v4832_v16 = vld [vmem:[#allocation67_spill] sm:$0xff] }
 0x37c   : > { %3001 = vst [vmem:[%s4507_s3 + $0x110] sm:$0xff] %v2891_v47   ;;  %v1850_v4 = vadd.f32 %v4067_v3, %v1743_v45  ;;  %v1746_v32 = vmul.f32 %v4816_v25, %v4041_v7  ;;  %v1747_v58 = vmul.f32 %v4817_v35, %v4041_v7  ;;  %v2901_v13 = vpack.c.bf16 %v1848_v63, %v1847_v51  ;;  %v4833_v55 = vld [vmem:[#allocation70_spill] sm:$0xff] }
 0x37d   : > { %3002 = vst [vmem:[%s4507_s3 + $0x118] sm:$0xff] %v2896_v21   ;;  %v1851_v37 = vadd.f32 %v4067_v3, %v1744_v22  ;;  %v1852_v26 = vadd.f32 %v4067_v3, %v1745_v43  ;;  %v1748_v36 = vmul.f32 %v4041_v7, %v4818_v30  ;;  %v1749_v23 = vmul.f32 %v4041_v7, %v4819_v60  ;;  %v4837_v60 = vld [vmem:[#allocation77_spill] sm:$0xff] }
 0x37e   : > { %v2906_v39 = vpack.c.bf16 %v1850_v4, %v1849_v62  ;;  %v1853_v9 = vadd.f32 %v4067_v3, %v1746_v32  ;;  %v1854_v40 = vadd.f32 %v4067_v3, %v1747_v58  ;;  %3003 = vst [vmem:[%s4507_s3 + $0x120] sm:$0xff] %v2901_v13   ;;  %v1750_v34 = vmul.f32 %v4820_v41, %v4041_v7  ;;  %v4834_v32 = vld [vmem:[#allocation75_spill] sm:$0xff] }
 0x37f   : > { %v2911_v11 = vpack.c.bf16 %v1852_v26, %v1851_v37  ;;  %v1855_v59 = vadd.f32 %v4067_v3, %v1748_v36  ;;  %v1751_v31 = vmul.f32 %v4821_v8, %v4041_v7  ;;  %v1856_v44 = vadd.f32 %v4067_v3, %v1749_v23  ;;  %v4835_v26 = vld [vmem:[#allocation79_spill] sm:$0xff] }
 0x380   : > { %3004 = vst [vmem:[%s4507_s3 + $0x128] sm:$0xff] %v2906_v39   ;;  %v2916_v38 = vpack.c.bf16 %v1854_v40, %v1853_v9  ;;  %v1752_v42 = vmul.f32 %v4041_v7, %v4822_v48  ;;  %v1753_v19 = vmul.f32 %v4041_v7, %v4823_v17  ;;  %v1857_v0 = vadd.f32 %v4067_v3, %v1750_v34  ;;  %v4836_v9 = vld [vmem:[#allocation73_spill] sm:$0xff] }
 0x381   : > { %3005 = vst [vmem:[%s4507_s3 + $0x130] sm:$0xff] %v2911_v11   ;;  %v1858_v46 = vadd.f32 %v4067_v3, %v1751_v31  ;;  %v1754_v2 = vmul.f32 %v4824_v24, %v4041_v7  ;;  %v1755_v53 = vmul.f32 %v4825_v18, %v4041_v7  ;;  %v2921_v6 = vpack.c.bf16 %v1856_v44, %v1855_v59 }
 0x382   : > { %3006 = vst [vmem:[%s4507_s3 + $0x138] sm:$0xff] %v2916_v38   ;;  %v1859_v52 = vadd.f32 %v4067_v3, %v1752_v42  ;;  %v1860_v56 = vadd.f32 %v4067_v3, %v1753_v19  ;;  %v1756_v61 = vmul.f32 %v4041_v7, %v4826_v5  ;;  %v1757_v28 = vmul.f32 %v4041_v7, %v4827_v50 }
 0x383   : > { %v2926_v20 = vpack.c.bf16 %v1858_v46, %v1857_v0  ;;  %v1861_v10 = vadd.f32 %v4067_v3, %v1754_v2  ;;  %v1862_v54 = vadd.f32 %v4067_v3, %v1755_v53  ;;  %3007 = vst [vmem:[%s4507_s3 + $0x140] sm:$0xff] %v2921_v6   ;;  %v1758_v33 = vmul.f32 %v4828_v1, %v4041_v7 }
 0x384   : > { %v2931_v49 = vpack.c.bf16 %v1860_v56, %v1859_v52  ;;  %v1863_v29 = vadd.f32 %v4067_v3, %v1756_v61  ;;  %v1759_v12 = vmul.f32 %v4829_v27, %v4041_v7  ;;  %v1864_v51 = vadd.f32 %v4067_v3, %v1757_v28 }
 0x385   : > { %3008 = vst [vmem:[%s4507_s3 + $0x148] sm:$0xff] %v2926_v20   ;;  %v2936_v47 = vpack.c.bf16 %v1862_v54, %v1861_v10  ;;  %v1760_v14 = vmul.f32 %v4041_v7, %v4830_v15  ;;  %v1761_v45 = vmul.f32 %v4041_v7, %v4831_v57  ;;  %v1865_v21 = vadd.f32 %v4067_v3, %v1758_v33 }
 0x386   : > { %3009 = vst [vmem:[%s4507_s3 + $0x150] sm:$0xff] %v2931_v49   ;;  %v1866_v63 = vadd.f32 %v4067_v3, %v1759_v12  ;;  %v1762_v22 = vmul.f32 %v4832_v16, %v4041_v7  ;;  %v1763_v43 = vmul.f32 %v4833_v55, %v4041_v7  ;;  %v2941_v62 = vpack.c.bf16 %v1864_v51, %v1863_v29 }
 0x387   : > { %3010 = vst [vmem:[%s4507_s3 + $0x158] sm:$0xff] %v2936_v47   ;;  %v1867_v4 = vadd.f32 %v4067_v3, %v1760_v14  ;;  %v1868_v25 = vadd.f32 %v4067_v3, %v1761_v45  ;;  %v1764_v35 = vmul.f32 %v4041_v7, %v4834_v32  ;;  %v1765_v30 = vmul.f32 %v4041_v7, %v4835_v26 }
 0x388   : > { %v2946_v58 = vpack.c.bf16 %v1866_v63, %v1865_v21  ;;  %v1869_v13 = vadd.f32 %v4067_v3, %v1762_v22  ;;  %v1870_v37 = vadd.f32 %v4067_v3, %v1763_v43  ;;  %3011 = vst [vmem:[%s4507_s3 + $0x160] sm:$0xff] %v2941_v62   ;;  %v1766_v40 = vmul.f32 %v4836_v9, %v4041_v7 }
 0x389   : > { %v2951_v36 = vpack.c.bf16 %v1868_v25, %v1867_v4  ;;  %v1871_v39 = vadd.f32 %v4067_v3, %v1764_v35  ;;  %v1767_v23 = vmul.f32 %v4837_v60, %v4041_v7  ;;  %v1872_v59 = vadd.f32 %v4067_v3, %v1765_v30 }
 0x38a   : > { %3012 = vst [vmem:[%s4507_s3 + $0x168] sm:$0xff] %v2946_v58   ;;  %v2956_v11 = vpack.c.bf16 %v1870_v37, %v1869_v13  ;;  %v1873_v41 = vadd.f32 %v4067_v3, %v1766_v40 }
 0x38b   : > { %3013 = vst [vmem:[%s4507_s3 + $0x170] sm:$0xff] %v2951_v36   ;;  %v1874_v34 = vadd.f32 %v4067_v3, %v1767_v23  ;;  %v2961_v7 = vpack.c.bf16 %v1872_v59, %v1871_v39 }
 0x38c   : > { %3014 = vst [vmem:[%s4507_s3 + $0x178] sm:$0xff] %v2956_v11  }
 0x38d   : > { %v2966_v8 = vpack.c.bf16 %v1874_v34, %v1873_v41  ;;  %3015 = vst [vmem:[%s4507_s3 + $0x180] sm:$0xff] %v2961_v7  }
 0x38f   : > { %3016 = vst [vmem:[%s4507_s3 + $0x188] sm:$0xff] %v2966_v8  }
 0x390 PF: > { %s13_s14 = sadd.s32 1, %s3314_s14   ;;  %s4838_s12 = smov %s3310_s13 }
 0x391   : > { %p10_p6 = scmp.ge.s32.totalorder %s13_s14, 4   ;;  %s4839_s13 = smov %s4841_s15 }
 0x393   :  { %12 = sbr.rel (!%p10_p6) target bundleno = 2 (0x2), region = 78 }

</bundles_post_ra>
